<compile_context>
chip_gen: v5e
topology: v5e:2x2
jax: 0.10.0
libtpu: 0.0.40
codegen_flags: <defaults>
</compile_context>

<pallas_src>
import math
import functools
import numpy as np

import jax
import jax.numpy as jnp
from jax.experimental import pallas as pl
from jax.experimental.pallas import tpu as pltpu

LOG2_E = math.log2(math.e)
MAX_TILE_N = 512          # max rows per grid step (multiple of 16)
V_PAD = 256               # 255 logits padded to a lane-dense 256
NEG_PAD_BIAS = -1e30      # poisons the padded logit lane (f32-safe)


def _round_up(n, m):
    return ((n + m - 1) // m) * m


def _padded_rows(n):
    """Pad row count: multiple of 32 (small n) / MAX_TILE_N (large n), >= 32."""
    n = max(n, 32)
    if n <= 2 * MAX_TILE_N:
        return _round_up(n, 32)
    return _round_up(n, MAX_TILE_N)


def _row_tile(n_padded):
    """Row tile: multiple of 16, divides n_padded, always >= 2 grid steps
    (so both v7x TensorCores get work), capped at MAX_TILE_N."""
    return min(MAX_TILE_N, n_padded // 2)


# ----------------------------------------------------------------------------
# Pallas kernels
# ----------------------------------------------------------------------------
def _linear_kernel(x_ref, w_ref, b_ref, *rest, alpha, has_res):
    """o = PReLU_alpha(x @ w + b [+ res]); bf16 matmul inputs, f32 accumulate."""
    if has_res:
        res_ref, o_ref = rest
    else:
        (o_ref,) = rest
    y = jnp.dot(x_ref[...], w_ref[...], preferred_element_type=jnp.float32)
    y = y + b_ref[...]
    if has_res:
        y = y + res_ref[...]
    if alpha != 1.0:                       # compile-time branch
        y = jnp.where(y >= 0.0, y, alpha * y)
    o_ref[...] = y.astype(o_ref.dtype)


def fused_linear(x, w, b, res=None, alpha=1.0, out_dtype=jnp.float32):
    """x: (Np, K) bf16, w: (K, Cout) bf16, b: (1, Cout) f32, res: (Np, Cout) f32."""
    Np, K = x.shape
    Cout = w.shape[1]
    tile = _row_tile(Np)
    assert Np % tile == 0 and tile % 8 == 0

    has_res = res is not None
    in_specs = [
        pl.BlockSpec((tile, K), lambda i: (i, 0)),
        pl.BlockSpec((K, Cout), lambda i: (0, 0)),
        pl.BlockSpec((1, Cout), lambda i: (0, 0)),
    ]
    args = [x, w, b]
    if has_res:
        in_specs.append(pl.BlockSpec((tile, Cout), lambda i: (i, 0)))
        args.append(res)

    return pl.pallas_call(
        functools.partial(_linear_kernel, alpha=float(alpha), has_res=has_res),
        out_shape=jax.ShapeDtypeStruct((Np, Cout), out_dtype),
        grid_spec=pltpu.PrefetchScalarGridSpec(
            num_scalar_prefetch=0,
            grid=(Np // tile,),
            in_specs=in_specs,
            out_specs=pl.BlockSpec((tile, Cout), lambda i: (i, 0)),
        ),
        compiler_params=pltpu.CompilerParams(
            dimension_semantics=("parallel",)),
    )(*args)


def _conv_linear_kernel(xg_ref, wc_ref, bc_ref, wl_ref, bl_ref, o_ref, *, alpha):
    """o = PReLU(xg @ wc + bc) @ wl + bl — conv matmul fused with the Linear."""
    p = jnp.dot(xg_ref[...], wc_ref[...],
                preferred_element_type=jnp.float32) + bc_ref[...]
    p = jnp.where(p >= 0.0, p, alpha * p)
    y = jnp.dot(p.astype(jnp.bfloat16), wl_ref[...],
                preferred_element_type=jnp.float32) + bl_ref[...]
    o_ref[...] = y.astype(o_ref.dtype)


def conv_linear(xg, wc, bc, wl, bl, alpha, out_dtype=jnp.bfloat16):
    """pred[0]: submanifold-conv slab -> PReLU -> Linear, one kernel, 256-lane out."""
    Np, K = xg.shape
    Cmid = wc.shape[1]
    Cout = wl.shape[1]
    tile = _row_tile(Np)
    assert Np % tile == 0 and tile % 8 == 0
    return pl.pallas_call(
        functools.partial(_conv_linear_kernel, alpha=float(alpha)),
        out_shape=jax.ShapeDtypeStruct((Np, Cout), out_dtype),
        grid_spec=pltpu.PrefetchScalarGridSpec(
            num_scalar_prefetch=0,
            grid=(Np // tile,),
            in_specs=[pl.BlockSpec((tile, K), lambda i: (i, 0)),
                      pl.BlockSpec((K, Cmid), lambda i: (0, 0)),
                      pl.BlockSpec((1, Cmid), lambda i: (0, 0)),
                      pl.BlockSpec((Cmid, Cout), lambda i: (0, 0)),
                      pl.BlockSpec((1, Cout), lambda i: (0, 0))],
            out_specs=pl.BlockSpec((tile, Cout), lambda i: (i, 0)),
        ),
        compiler_params=pltpu.CompilerParams(
            dimension_semantics=("parallel",)),
    )(xg, wc, bc, wl, bl)


def _conv_linear_ce_kernel(xg_ref, lab_ref, wc_ref, bc_ref, wl_ref, bl_ref,
                           o_ref, *, alpha):
    """pred[-1] conv -> PReLU -> Linear(256) -> CE partial sum, all in VMEM."""
    q = jnp.dot(xg_ref[...], wc_ref[...],
                preferred_element_type=jnp.float32) + bc_ref[...]
    q = jnp.where(q >= 0.0, q, alpha * q)
    logits = jnp.dot(q.astype(jnp.bfloat16), wl_ref[...],
                     preferred_element_type=jnp.float32) + bl_ref[...]
    labels = lab_ref[...]                                    # (tile, 1) int32
    col = jax.lax.broadcasted_iota(jnp.int32, logits.shape, 1)
    # Pad lane 255 has bias -1e30 -> contributes exactly 0 to the softmax sum.
    m = jnp.max(logits, axis=1, keepdims=True)
    lse = jnp.log(jnp.sum(jnp.exp(logits - m), axis=1, keepdims=True)) + m
    tgt = jnp.sum(jnp.where(col == labels, logits, 0.0), axis=1, keepdims=True)
    row_ok = (labels >= 0).astype(jnp.float32)               # pad rows: label -1
    part = jnp.sum((lse - tgt) * row_ok)
    o_ref[...] = jnp.full(o_ref.shape, part, jnp.float32)    # per-tile partial


def conv_linear_ce(xg, labels, wc, bc, wl, bl, alpha):
    """Returns the unscaled CE sum over all (unpadded) rows."""
    Np, K = xg.shape
    Cmid = wc.shape[1]
    V = wl.shape[1]
    tile = _row_tile(Np)
    assert Np % tile == 0 and tile % 8 == 0
    ntiles = Np // tile
    partials = pl.pallas_call(
        functools.partial(_conv_linear_ce_kernel, alpha=float(alpha)),
        out_shape=jax.ShapeDtypeStruct((ntiles, 8, 128), jnp.float32),
        grid_spec=pltpu.PrefetchScalarGridSpec(
            num_scalar_prefetch=0,
            grid=(ntiles,),
            in_specs=[pl.BlockSpec((tile, K), lambda i: (i, 0)),
                      pl.BlockSpec((tile, 1), lambda i: (i, 0)),
                      pl.BlockSpec((K, Cmid), lambda i: (0, 0)),
                      pl.BlockSpec((1, Cmid), lambda i: (0, 0)),
                      pl.BlockSpec((Cmid, V), lambda i: (0, 0)),
                      pl.BlockSpec((1, V), lambda i: (0, 0))],
            out_specs=pl.BlockSpec((1, 8, 128), lambda i: (i, 0, 0)),
        ),
        compiler_params=pltpu.CompilerParams(
            dimension_semantics=("parallel",)),
    )(xg, labels, wc, bc, wl, bl)
    return jnp.sum(partials[:, 0, 0])


# ----------------------------------------------------------------------------
# XLA-side neighbor gather (device, no host sync)
# ----------------------------------------------------------------------------
def gather27(x, nbr_idx):
    """Kernel-map gather: (Np, Cin) -> (Np, 27*Cin) bf16 slab.
    # TODO(synk): replace with an in-kernel DMA/dynamic gather (nbr table
    # scalar-prefetched, activation resident in VMEM) to avoid the 27x HBM slab.
    """
    Np, Cin = x.shape
    x16 = x.astype(jnp.bfloat16)
    idx_t = jnp.maximum(nbr_idx, 0).T                        # (Np, 27)
    mask = (nbr_idx >= 0).T[..., None]                       # (Np, 27, 1)
    return jnp.where(mask, x16[idx_t], 0).reshape(Np, 27 * Cin)


# ----------------------------------------------------------------------------
# Host-side glue: kernel map for the submanifold 3x3x3 sparse conv (built
# BEFORE the forward so no mid-forward host sync occurs).
# ----------------------------------------------------------------------------
_OFFSETS = np.array([(dx, dy, dz) for dx in (-1, 0, 1)
                     for dy in (-1, 0, 1) for dz in (-1, 0, 1)], dtype=np.int64)


def build_neighbor_idx(coords, n_pad):
    # TODO(synk): torchsparse builds this kernel map with a GPU hash table; here
    # it is host-side glue (data-dependent sparse structure, not the hot path).
    coords = np.asarray(coords, dtype=np.int64)
    table = {tuple(c): i for i, c in enumerate(coords.tolist())}
    N = coords.shape[0]
    nbr = np.full((27, n_pad), -1, dtype=np.int32)
    for k, off in enumerate(_OFFSETS):
        q = coords.copy()
        q[:, 1:] += off
        for i in range(N):
            nbr[k, i] = table.get(tuple(q[i].tolist()), -1)
    return jnp.asarray(nbr)


# ----------------------------------------------------------------------------
# Parameters (deterministic synthetic init; PReLU alpha = 0.25, PyTorch default)
# ----------------------------------------------------------------------------
def init_params(key, channels):
    C = channels
    ks = jax.random.split(key, 14)
    w = lambda k, shape: 0.1 * jax.random.normal(k, shape, jnp.float32)
    return {
        'dec_lin_w': w(ks[0], (C + 8, C)),   'dec_lin_b': w(ks[1], (1, C)),
        'blk_c1_w':  w(ks[2], (27, C, C)),   'blk_c1_b':  w(ks[3], (1, C)),
        'blk_c2_w':  w(ks[4], (27, C, C)),   'blk_c2_b':  w(ks[5], (1, C)),
        'p0_conv_w': w(ks[6], (27, C, C)),   'p0_conv_b': w(ks[7], (1, C)),
        'p0_lin_w':  w(ks[8], (C, 8 * C)),   'p0_lin_b':  w(ks[9], (1, 8 * C)),
        'p1_conv_w': w(ks[10], (27, C, C)),  'p1_conv_b': w(ks[11], (1, C)),
        'p1_lin_w':  w(ks[12], (C, 255)),    'p1_lin_b':  w(ks[13], (1, 255)),
    }


def prepare_params(params):
    """One-time weight prep: (27,Cin,Cout)->(27*Cin,Cout), bf16 compute copies,
    lane-dense 256-wide final Linear with a -1e30-poisoned pad-lane bias.
    f32 masters stay in `params` (e.g. for training)."""
    cw = lambda w: w.reshape(-1, w.shape[-1]).astype(jnp.bfloat16)
    return {
        'dec_lin_w': params['dec_lin_w'].astype(jnp.bfloat16),
        'dec_lin_b': params['dec_lin_b'],
        'blk_c1_w': cw(params['blk_c1_w']),  'blk_c1_b': params['blk_c1_b'],
        'blk_c2_w': cw(params['blk_c2_w']),  'blk_c2_b': params['blk_c2_b'],
        'p0_conv_w': cw(params['p0_conv_w']), 'p0_conv_b': params['p0_conv_b'],
        'p0_lin_w': params['p0_lin_w'].astype(jnp.bfloat16),
        'p0_lin_b': params['p0_lin_b'],
        'p1_conv_w': cw(params['p1_conv_w']), 'p1_conv_b': params['p1_conv_b'],
        'p1_lin_w': jnp.pad(params['p1_lin_w'],
                            ((0, 0), (0, V_PAD - 255))).astype(jnp.bfloat16),
        'p1_lin_b': jnp.pad(params['p1_lin_b'], ((0, 0), (0, V_PAD - 255)),
                            constant_values=NEG_PAD_BIAS),
    }


# ----------------------------------------------------------------------------
# Forward pass (pred_steps = 2); fully device-side, jit-able, no static args.
# ----------------------------------------------------------------------------
def one_scale_multistep_predictor_forward(prep, rec_F, bins1_F, nbr_c, flat_sel,
                                          nbr_f, bins0_F, bin2oct_kernel, scale):
    a = 0.25
    C = rec_F.shape[1]
    N0 = rec_F.shape[0]
    N0p = nbr_c.shape[1]
    M = bins0_F.shape[0]
    Mp = nbr_f.shape[1]

    # self.embed = SparseSequential() -> identity; concat [cur_rec.F, embed_f]
    x = jnp.concatenate([rec_F.astype(jnp.bfloat16),
                         bins1_F.astype(jnp.bfloat16)], axis=1)
    x = jnp.pad(x, ((0, N0p - N0), (0, 0)))                  # (N0p, C+8) bf16

    # self.dec = Linear(C+8, C) -> PReLU -> Block(C)
    h = fused_linear(x, prep['dec_lin_w'], prep['dec_lin_b'], alpha=a,
                     out_dtype=jnp.float32)                  # residual -> f32
    t = fused_linear(gather27(h, nbr_c), prep['blk_c1_w'], prep['blk_c1_b'],
                     alpha=a, out_dtype=jnp.bfloat16)
    rec_out = fused_linear(gather27(t, nbr_c), prep['blk_c2_w'],
                           prep['blk_c2_b'], res=h, alpha=a,
                           out_dtype=jnp.float32)            # (N0p, C), returned

    # self.pred[0] = Conv3d -> PReLU -> Linear(C, 8C), fused in one kernel
    pred = conv_linear(gather27(rec_out, nbr_c), prep['p0_conv_w'],
                       prep['p0_conv_b'], prep['p0_lin_w'], prep['p0_lin_b'],
                       alpha=a)                              # (N0p, 8C) bf16

    # child selection: reshape(.,8,C)[bins1.bool()] — flat indices precomputed
    # on host, gather stays on device (no sync).
    sel = pred.reshape(N0p * 8, C)[flat_sel]                 # (M, C) bf16
    sel = jnp.pad(sel, ((0, Mp - M), (0, 0)))

    # cur_oct = (bins0 << bin2oct_kernel).sum(1) - 1; pad rows get label -1
    cur_oct = jnp.sum(bins0_F.astype(jnp.int32) << bin2oct_kernel.astype(jnp.int32),
                      axis=1) - 1
    labels = jnp.pad(cur_oct, (0, Mp - M), constant_values=-1).reshape(Mp, 1)

    # self.pred[1] = Conv3d -> PReLU -> Linear(C, 255) fused with the CE
    # reduction; the (Mp, 256) logits never leave VMEM.
    nll = conv_linear_ce(gather27(sel, nbr_f), labels, prep['p1_conv_w'],
                         prep['p1_conv_b'], prep['p1_lin_w'], prep['p1_lin_b'],
                         alpha=a)

    # batch_size == 1 branch: CE(reduction='sum') * log2(e) / bs / points_num
    loss = nll * scale
    return rec_out[:N0], loss


# ----------------------------------------------------------------------------
# Pure-JAX reference (mirrors the bf16-input / f32-accumulate matmul choice)
# ----------------------------------------------------------------------------
def _prelu(x, a):
    return jnp.where(x >= 0, x, a * x)


def _bf16_dot(x, w):
    return jnp.dot(x.astype(jnp.bfloat16), w.astype(jnp.bfloat16),
                   preferred_element_type=jnp.float32)


def _ref_conv(x, nbr, w27, b):
    idx = jnp.maximum(nbr, 0)
    xg = jnp.where((nbr >= 0)[..., None], x[idx].astype(jnp.float32), 0.0)
    xg = jnp.transpose(xg, (1, 0, 2)).reshape(x.shape[0], -1)
    return _bf16_dot(xg, w27.reshape(xg.shape[1], -1)) + b


def ref_forward(params, rec_F, bins1_F, nbr_c_pad, flat_sel, nbr_f_pad,
                bins0_F, bin2oct_kernel, scale):
    a = 0.25
    C = rec_F.shape[1]
    N0 = rec_F.shape[0]
    M = bins0_F.shape[0]
    nbr_c = nbr_c_pad[:, :N0]
    nbr_f = nbr_f_pad[:, :M]
    x = jnp.concatenate([rec_F, bins1_F.astype(jnp.float32)], 1)
    h = _prelu(_bf16_dot(x, params['dec_lin_w']) + params['dec_lin_b'], a)
    t = _prelu(_ref_conv(h, nbr_c, params['blk_c1_w'], params['blk_c1_b']), a)
    rec_out = _prelu(_ref_conv(t, nbr_c, params['blk_c2_w'],
                               params['blk_c2_b']) + h, a)
    p = _prelu(_ref_conv(rec_out, nbr_c, params['p0_conv_w'],
                         params['p0_conv_b']), a)
    p = _bf16_dot(p, params['p0_lin_w']) + params['p0_lin_b']
    sel = p.reshape(N0 * 8, C)[flat_sel]
    q = _prelu(_ref_conv(sel, nbr_f, params['p1_conv_w'], params['p1_conv_b']), a)
    logits = _bf16_dot(q, params['p1_lin_w']) + params['p1_lin_b']
    labels = jnp.sum(bins0_F.astype(jnp.int32) << bin2oct_kernel.astype(jnp.int32),
                     1) - 1
    logp = jax.nn.log_softmax(logits, axis=1)
    nll = -jnp.take_along_axis(logp, labels[:, None], axis=1).sum()
    return rec_out, nll * scale


# ----------------------------------------------------------------------------
if __name__ == "__main__":
    C = 32                      # channels
    key = jax.random.PRNGKey(0)
    k_coords, k_bins1, k_bins0, k_rec, k_params = jax.random.split(key, 5)

    # Coarse scale: 16 occupied cells out of a 3x3x3 grid (batch index 0).
    grid = np.stack(np.meshgrid(np.arange(3), np.arange(3), np.arange(3),
                                indexing='ij'), -1).reshape(-1, 3)
    sel_idx = np.sort(np.asarray(
        jax.random.choice(k_coords, grid.shape[0], (16,), replace=False)))
    coarse_coords = np.concatenate(
        [np.zeros((16, 1), np.int64), grid[sel_idx].astype(np.int64)], 1)
    N0 = coarse_coords.shape[0]

    # cur_bins[1]: per-coarse-cell 8-bit child occupancy (>= 1 bit per row).
    bins1 = jax.random.bernoulli(k_bins1, 0.5, (N0, 8)).astype(jnp.int32)
    bins1 = bins1.at[:, 0].set(jnp.where(bins1.sum(1) == 0, 1, bins1[:, 0]))
    bins1_np = np.asarray(bins1)          # host copy taken BEFORE the forward

    # Fine coords: children of occupied child slots, row-major over (cell, bit).
    fine = []
    for i in range(N0):
        for k in range(8):
            if bins1_np[i, k]:
                off = np.array([(k >> 2) & 1, (k >> 1) & 1, k & 1], np.int64)
                fine.append(np.concatenate([[0], 2 * coarse_coords[i, 1:] + off]))
    fine_coords = np.stack(fine, 0)
    M = fine_coords.shape[0]

    # cur_bins[0]: per-fine-cell 8-bit occupancy (>= 1 bit so target in [0, 254]).
    bins0 = jax.random.bernoulli(k_bins0, 0.5, (M, 8)).astype(jnp.int32)
    bins0 = bins0.at[:, 0].set(jnp.where(bins0.sum(1) == 0, 1, bins0[:, 0]))

    rec_F = jax.random.normal(k_rec, (N0, C), jnp.float32)   # cur_rec.F
    params = init_params(k_params, C)
    prep = prepare_params(params)                            # one-time weight prep
    bin2oct_kernel = jnp.arange(8, dtype=jnp.int32)
    points_num = [1000.0]
    batch_size = len(points_num)
    scale = LOG2_E / batch_size / float(points_num[0])       # runtime scalar

    # Precompute all data-dependent sparse structure on host (no mid-fwd sync).
    N0p = _padded_rows(N0)
    Mp = _padded_rows(M)
    nbr_c = build_neighbor_idx(coarse_coords, N0p)           # (27, N0p)
    nbr_f = build_neighbor_idx(fine_coords, Mp)              # (27, Mp)
    flat_sel = jnp.asarray(np.flatnonzero(bins1_np.reshape(-1)).astype(np.int32))

    fwd = jax.jit(one_scale_multistep_predictor_forward)
    rec_out, loss = fwd(prep, rec_F, bins1, nbr_c, flat_sel, nbr_f,
                        bins0, bin2oct_kernel, scale)
    jax.block_until_ready((rec_out, loss))

    ref_rec, ref_loss = ref_forward(params, rec_F, bins1, nbr_c, flat_sel,
                                    nbr_f, bins0, bin2oct_kernel, scale)
    assert np.allclose(np.asarray(rec_out), np.asarray(ref_rec),
                       rtol=2e-2, atol=2e-2), "rec mismatch"
    assert np.allclose(float(loss), float(ref_loss),
                       rtol=2e-2, atol=2e-2), "loss mismatch"

    print("KERNEL_OK")
</pallas_src>

<mosaic_0001>
module attributes {stable_mosaic.version = 11 : i64} {
  func.func @_linear_kernel(%arg0: i32, %arg1: memref<16x40xbf16, #tpu.memory_space<vmem>>, %arg2: memref<40x32xbf16, #tpu.memory_space<vmem>>, %arg3: memref<1x32xf32, #tpu.memory_space<vmem>>, %arg4: memref<16x32xf32, #tpu.memory_space<vmem>>) attributes {dimension_semantics = [#tpu.dimension_semantics<parallel>], iteration_bounds = array<i64: 2>, scalar_prefetch = 0 : i64, scratch_operands = 0 : i64, tpu.core_type = #tpu.core_type<tc>, window_params = [{transform_indices = @transform_0, window_bounds = array<i64: 16, 40>}, {pipeline_mode = #tpu.pipeline_mode<synchronous>, transform_indices = @transform_1, window_bounds = array<i64: 40, 32>}, {pipeline_mode = #tpu.pipeline_mode<synchronous>, transform_indices = @transform_2, window_bounds = array<i64: 1, 32>}, {transform_indices = @transform_3, window_bounds = array<i64: 16, 32>}]} {
    %c0 = arith.constant 0 : index
    %c0_0 = arith.constant 0 : index
    %0 = vector.load %arg1[%c0, %c0_0] : memref<16x40xbf16, #tpu.memory_space<vmem>>, vector<16x40xbf16>
    %c0_1 = arith.constant 0 : index
    %c0_2 = arith.constant 0 : index
    %1 = vector.load %arg2[%c0_1, %c0_2] : memref<40x32xbf16, #tpu.memory_space<vmem>>, vector<40x32xbf16>
    %cst = arith.constant dense<0.000000e+00> : vector<16x32xf32>
    %2 = tpu.matmul %0, %1, %cst {dimension_numbers = #tpu.dot_dimension_numbers<[1], [0], [0], [1], [0, 0, 1, 1], [], []>} : vector<16x40xbf16>, vector<40x32xbf16>, vector<16x32xf32> -> vector<16x32xf32>
    %c0_3 = arith.constant 0 : index
    %c0_4 = arith.constant 0 : index
    %3 = vector.load %arg3[%c0_3, %c0_4] : memref<1x32xf32, #tpu.memory_space<vmem>>, vector<1x32xf32>
    %4 = vector.broadcast %3 : vector<1x32xf32> to vector<16x32xf32>
    %5 = arith.addf %2, %4 : vector<16x32xf32>
    %cst_5 = arith.constant 0.000000e+00 : f32
    %6 = vector.broadcast %cst_5 : f32 to vector<16x32xf32>
    %7 = arith.cmpf oge, %5, %6 : vector<16x32xf32>
    %cst_6 = arith.constant 2.500000e-01 : f32
    %8 = vector.broadcast %cst_6 : f32 to vector<16x32xf32>
    %9 = arith.mulf %8, %5 : vector<16x32xf32>
    %10 = arith.select %7, %5, %9 : vector<16x32xi1>, vector<16x32xf32>
    %c0_7 = arith.constant 0 : index
    %c0_8 = arith.constant 0 : index
    %11 = vector.load %arg4[%c0_7, %c0_8] : memref<16x32xf32, #tpu.memory_space<vmem>>, vector<16x32xf32>
    tpu.vector_store %arg4[%c0_7, %c0_8], %10 {strides = array<i32>} : memref<16x32xf32, #tpu.memory_space<vmem>>, vector<16x32xf32>,
    return
  }
  func.func @transform_0(%arg0: i32) -> (i32, i32) {
    %c0_i32 = arith.constant 0 : i32
    %c0_i32_0 = arith.constant 0 : i32
    return %arg0, %c0_i32 : i32, i32
  }
  func.func @transform_1(%arg0: i32) -> (i32, i32) {
    %c0_i32 = arith.constant 0 : i32
    %c0_i32_0 = arith.constant 0 : i32
    %c0_i32_1 = arith.constant 0 : i32
    return %c0_i32, %c0_i32_0 : i32, i32
  }
  func.func @transform_2(%arg0: i32) -> (i32, i32) {
    %c0_i32 = arith.constant 0 : i32
    %c0_i32_0 = arith.constant 0 : i32
    %c0_i32_1 = arith.constant 0 : i32
    return %c0_i32, %c0_i32_0 : i32, i32
  }
  func.func @transform_3(%arg0: i32) -> (i32, i32) {
    %c0_i32 = arith.constant 0 : i32
    %c0_i32_0 = arith.constant 0 : i32
    return %arg0, %c0_i32 : i32, i32
  }
}

module attributes {stable_mosaic.version = 11 : i64} {
  func.func @_linear_kernel(%arg0: i32, %arg1: memref<16x864xbf16, #tpu.memory_space<vmem>>, %arg2: memref<864x32xbf16, #tpu.memory_space<vmem>>, %arg3: memref<1x32xf32, #tpu.memory_space<vmem>>, %arg4: memref<16x32xbf16, #tpu.memory_space<vmem>>) attributes {dimension_semantics = [#tpu.dimension_semantics<parallel>], iteration_bounds = array<i64: 2>, scalar_prefetch = 0 : i64, scratch_operands = 0 : i64, tpu.core_type = #tpu.core_type<tc>, window_params = [{transform_indices = @transform_0, window_bounds = array<i64: 16, 864>}, {pipeline_mode = #tpu.pipeline_mode<synchronous>, transform_indices = @transform_1, window_bounds = array<i64: 864, 32>}, {pipeline_mode = #tpu.pipeline_mode<synchronous>, transform_indices = @transform_2, window_bounds = array<i64: 1, 32>}, {transform_indices = @transform_3, window_bounds = array<i64: 16, 32>}]} {
    %c0 = arith.constant 0 : index
    %c0_0 = arith.constant 0 : index
    %0 = vector.load %arg1[%c0, %c0_0] : memref<16x864xbf16, #tpu.memory_space<vmem>>, vector<16x864xbf16>
    %c0_1 = arith.constant 0 : index
    %c0_2 = arith.constant 0 : index
    %1 = vector.load %arg2[%c0_1, %c0_2] : memref<864x32xbf16, #tpu.memory_space<vmem>>, vector<864x32xbf16>
    %cst = arith.constant dense<0.000000e+00> : vector<16x32xf32>
    %2 = tpu.matmul %0, %1, %cst {dimension_numbers = #tpu.dot_dimension_numbers<[1], [0], [0], [1], [0, 0, 1, 1], [], []>} : vector<16x864xbf16>, vector<864x32xbf16>, vector<16x32xf32> -> vector<16x32xf32>
    %c0_3 = arith.constant 0 : index
    %c0_4 = arith.constant 0 : index
    %3 = vector.load %arg3[%c0_3, %c0_4] : memref<1x32xf32, #tpu.memory_space<vmem>>, vector<1x32xf32>
    %4 = vector.broadcast %3 : vector<1x32xf32> to vector<16x32xf32>
    %5 = arith.addf %2, %4 : vector<16x32xf32>
    %cst_5 = arith.constant 0.000000e+00 : f32
    %6 = vector.broadcast %cst_5 : f32 to vector<16x32xf32>
    %7 = arith.cmpf oge, %5, %6 : vector<16x32xf32>
    %cst_6 = arith.constant 2.500000e-01 : f32
    %8 = vector.broadcast %cst_6 : f32 to vector<16x32xf32>
    %9 = arith.mulf %8, %5 : vector<16x32xf32>
    %10 = arith.select %7, %5, %9 : vector<16x32xi1>, vector<16x32xf32>
    %11 = arith.truncf %10 : vector<16x32xf32> to vector<16x32xbf16>
    %c0_7 = arith.constant 0 : index
    %c0_8 = arith.constant 0 : index
    %12 = vector.load %arg4[%c0_7, %c0_8] : memref<16x32xbf16, #tpu.memory_space<vmem>>, vector<16x32xbf16>
    tpu.vector_store %arg4[%c0_7, %c0_8], %11 {strides = array<i32>} : memref<16x32xbf16, #tpu.memory_space<vmem>>, vector<16x32xbf16>,
    return
  }
  func.func @transform_0(%arg0: i32) -> (i32, i32) {
    %c0_i32 = arith.constant 0 : i32
    %c0_i32_0 = arith.constant 0 : i32
    return %arg0, %c0_i32 : i32, i32
  }
  func.func @transform_1(%arg0: i32) -> (i32, i32) {
    %c0_i32 = arith.constant 0 : i32
    %c0_i32_0 = arith.constant 0 : i32
    %c0_i32_1 = arith.constant 0 : i32
    return %c0_i32, %c0_i32_0 : i32, i32
  }
  func.func @transform_2(%arg0: i32) -> (i32, i32) {
    %c0_i32 = arith.constant 0 : i32
    %c0_i32_0 = arith.constant 0 : i32
    %c0_i32_1 = arith.constant 0 : i32
    return %c0_i32, %c0_i32_0 : i32, i32
  }
  func.func @transform_3(%arg0: i32) -> (i32, i32) {
    %c0_i32 = arith.constant 0 : i32
    %c0_i32_0 = arith.constant 0 : i32
    return %arg0, %c0_i32 : i32, i32
  }
}

module attributes {stable_mosaic.version = 11 : i64} {
  func.func @_linear_kernel(%arg0: i32, %arg1: memref<16x864xbf16, #tpu.memory_space<vmem>>, %arg2: memref<864x32xbf16, #tpu.memory_space<vmem>>, %arg3: memref<1x32xf32, #tpu.memory_space<vmem>>, %arg4: memref<16x32xf32, #tpu.memory_space<vmem>>, %arg5: memref<16x32xf32, #tpu.memory_space<vmem>>) attributes {dimension_semantics = [#tpu.dimension_semantics<parallel>], iteration_bounds = array<i64: 2>, scalar_prefetch = 0 : i64, scratch_operands = 0 : i64, tpu.core_type = #tpu.core_type<tc>, window_params = [{transform_indices = @transform_0, window_bounds = array<i64: 16, 864>}, {pipeline_mode = #tpu.pipeline_mode<synchronous>, transform_indices = @transform_1, window_bounds = array<i64: 864, 32>}, {pipeline_mode = #tpu.pipeline_mode<synchronous>, transform_indices = @transform_2, window_bounds = array<i64: 1, 32>}, {transform_indices = @transform_3, window_bounds = array<i64: 16, 32>}, {transform_indices = @transform_4, window_bounds = array<i64: 16, 32>}]} {
    %c0 = arith.constant 0 : index
    %c0_0 = arith.constant 0 : index
    %0 = vector.load %arg1[%c0, %c0_0] : memref<16x864xbf16, #tpu.memory_space<vmem>>, vector<16x864xbf16>
    %c0_1 = arith.constant 0 : index
    %c0_2 = arith.constant 0 : index
    %1 = vector.load %arg2[%c0_1, %c0_2] : memref<864x32xbf16, #tpu.memory_space<vmem>>, vector<864x32xbf16>
    %cst = arith.constant dense<0.000000e+00> : vector<16x32xf32>
    %2 = tpu.matmul %0, %1, %cst {dimension_numbers = #tpu.dot_dimension_numbers<[1], [0], [0], [1], [0, 0, 1, 1], [], []>} : vector<16x864xbf16>, vector<864x32xbf16>, vector<16x32xf32> -> vector<16x32xf32>
    %c0_3 = arith.constant 0 : index
    %c0_4 = arith.constant 0 : index
    %3 = vector.load %arg3[%c0_3, %c0_4] : memref<1x32xf32, #tpu.memory_space<vmem>>, vector<1x32xf32>
    %4 = vector.broadcast %3 : vector<1x32xf32> to vector<16x32xf32>
    %5 = arith.addf %2, %4 : vector<16x32xf32>
    %c0_5 = arith.constant 0 : index
    %c0_6 = arith.constant 0 : index
    %6 = vector.load %arg4[%c0_5, %c0_6] : memref<16x32xf32, #tpu.memory_space<vmem>>, vector<16x32xf32>
    %7 = arith.addf %5, %6 : vector<16x32xf32>
    %cst_7 = arith.constant 0.000000e+00 : f32
    %8 = vector.broadcast %cst_7 : f32 to vector<16x32xf32>
    %9 = arith.cmpf oge, %7, %8 : vector<16x32xf32>
    %cst_8 = arith.constant 2.500000e-01 : f32
    %10 = vector.broadcast %cst_8 : f32 to vector<16x32xf32>
    %11 = arith.mulf %10, %7 : vector<16x32xf32>
    %12 = arith.select %9, %7, %11 : vector<16x32xi1>, vector<16x32xf32>
    %c0_9 = arith.constant 0 : index
    %c0_10 = arith.constant 0 : index
    %13 = vector.load %arg5[%c0_9, %c0_10] : memref<16x32xf32, #tpu.memory_space<vmem>>, vector<16x32xf32>
    tpu.vector_store %arg5[%c0_9, %c0_10], %12 {strides = array<i32>} : memref<16x32xf32, #tpu.memory_space<vmem>>, vector<16x32xf32>,
    return
  }
  func.func @transform_0(%arg0: i32) -> (i32, i32) {
    %c0_i32 = arith.constant 0 : i32
    %c0_i32_0 = arith.constant 0 : i32
    return %arg0, %c0_i32 : i32, i32
  }
  func.func @transform_1(%arg0: i32) -> (i32, i32) {
    %c0_i32 = arith.constant 0 : i32
    %c0_i32_0 = arith.constant 0 : i32
    %c0_i32_1 = arith.constant 0 : i32
    return %c0_i32, %c0_i32_0 : i32, i32
  }
  func.func @transform_2(%arg0: i32) -> (i32, i32) {
    %c0_i32 = arith.constant 0 : i32
    %c0_i32_0 = arith.constant 0 : i32
    %c0_i32_1 = arith.constant 0 : i32
    return %c0_i32, %c0_i32_0 : i32, i32
  }
  func.func @transform_3(%arg0: i32) -> (i32, i32) {
    %c0_i32 = arith.constant 0 : i32
    %c0_i32_0 = arith.constant 0 : i32
    return %arg0, %c0_i32 : i32, i32
  }
  func.func @transform_4(%arg0: i32) -> (i32, i32) {
    %c0_i32 = arith.constant 0 : i32
    %c0_i32_0 = arith.constant 0 : i32
    return %arg0, %c0_i32 : i32, i32
  }
}

module attributes {stable_mosaic.version = 11 : i64} {
  func.func @_conv_linear_kernel(%arg0: i32, %arg1: memref<16x864xbf16, #tpu.memory_space<vmem>>, %arg2: memref<864x32xbf16, #tpu.memory_space<vmem>>, %arg3: memref<1x32xf32, #tpu.memory_space<vmem>>, %arg4: memref<32x256xbf16, #tpu.memory_space<vmem>>, %arg5: memref<1x256xf32, #tpu.memory_space<vmem>>, %arg6: memref<16x256xbf16, #tpu.memory_space<vmem>>) attributes {dimension_semantics = [#tpu.dimension_semantics<parallel>], iteration_bounds = array<i64: 2>, scalar_prefetch = 0 : i64, scratch_operands = 0 : i64, tpu.core_type = #tpu.core_type<tc>, window_params = [{transform_indices = @transform_0, window_bounds = array<i64: 16, 864>}, {pipeline_mode = #tpu.pipeline_mode<synchronous>, transform_indices = @transform_1, window_bounds = array<i64: 864, 32>}, {pipeline_mode = #tpu.pipeline_mode<synchronous>, transform_indices = @transform_2, window_bounds = array<i64: 1, 32>}, {pipeline_mode = #tpu.pipeline_mode<synchronous>, transform_indices = @transform_3, window_bounds = array<i64: 32, 256>}, {pipeline_mode = #tpu.pipeline_mode<synchronous>, transform_indices = @transform_4, window_bounds = array<i64: 1, 256>}, {transform_indices = @transform_5, window_bounds = array<i64: 16, 256>}]} {
    %c0 = arith.constant 0 : index
    %c0_0 = arith.constant 0 : index
    %0 = vector.load %arg1[%c0, %c0_0] : memref<16x864xbf16, #tpu.memory_space<vmem>>, vector<16x864xbf16>
    %c0_1 = arith.constant 0 : index
    %c0_2 = arith.constant 0 : index
    %1 = vector.load %arg2[%c0_1, %c0_2] : memref<864x32xbf16, #tpu.memory_space<vmem>>, vector<864x32xbf16>
    %cst = arith.constant dense<0.000000e+00> : vector<16x32xf32>
    %2 = tpu.matmul %0, %1, %cst {dimension_numbers = #tpu.dot_dimension_numbers<[1], [0], [0], [1], [0, 0, 1, 1], [], []>} : vector<16x864xbf16>, vector<864x32xbf16>, vector<16x32xf32> -> vector<16x32xf32>
    %c0_3 = arith.constant 0 : index
    %c0_4 = arith.constant 0 : index
    %3 = vector.load %arg3[%c0_3, %c0_4] : memref<1x32xf32, #tpu.memory_space<vmem>>, vector<1x32xf32>
    %4 = vector.broadcast %3 : vector<1x32xf32> to vector<16x32xf32>
    %5 = arith.addf %2, %4 : vector<16x32xf32>
    %cst_5 = arith.constant 0.000000e+00 : f32
    %6 = vector.broadcast %cst_5 : f32 to vector<16x32xf32>
    %7 = arith.cmpf oge, %5, %6 : vector<16x32xf32>
    %cst_6 = arith.constant 2.500000e-01 : f32
    %8 = vector.broadcast %cst_6 : f32 to vector<16x32xf32>
    %9 = arith.mulf %8, %5 : vector<16x32xf32>
    %10 = arith.select %7, %5, %9 : vector<16x32xi1>, vector<16x32xf32>
    %11 = arith.truncf %10 : vector<16x32xf32> to vector<16x32xbf16>
    %c0_7 = arith.constant 0 : index
    %c0_8 = arith.constant 0 : index
    %12 = vector.load %arg4[%c0_7, %c0_8] : memref<32x256xbf16, #tpu.memory_space<vmem>>, vector<32x256xbf16>
    %cst_9 = arith.constant dense<0.000000e+00> : vector<16x256xf32>
    %13 = tpu.matmul %11, %12, %cst_9 {dimension_numbers = #tpu.dot_dimension_numbers<[1], [0], [0], [1], [0, 0, 1, 1], [], []>} : vector<16x32xbf16>, vector<32x256xbf16>, vector<16x256xf32> -> vector<16x256xf32>
    %c0_10 = arith.constant 0 : index
    %c0_11 = arith.constant 0 : index
    %14 = vector.load %arg5[%c0_10, %c0_11] : memref<1x256xf32, #tpu.memory_space<vmem>>, vector<1x256xf32>
    %15 = vector.broadcast %14 : vector<1x256xf32> to vector<16x256xf32>
    %16 = arith.addf %13, %15 : vector<16x256xf32>
    %17 = arith.truncf %16 : vector<16x256xf32> to vector<16x256xbf16>
    %c0_12 = arith.constant 0 : index
    %c0_13 = arith.constant 0 : index
    %18 = vector.load %arg6[%c0_12, %c0_13] : memref<16x256xbf16, #tpu.memory_space<vmem>>, vector<16x256xbf16>
    tpu.vector_store %arg6[%c0_12, %c0_13], %17 {strides = array<i32>} : memref<16x256xbf16, #tpu.memory_space<vmem>>, vector<16x256xbf16>,
    return
  }
  func.func @transform_0(%arg0: i32) -> (i32, i32) {
    %c0_i32 = arith.constant 0 : i32
    %c0_i32_0 = arith.constant 0 : i32
    return %arg0, %c0_i32 : i32, i32
  }
  func.func @transform_1(%arg0: i32) -> (i32, i32) {
    %c0_i32 = arith.constant 0 : i32
    %c0_i32_0 = arith.constant 0 : i32
    %c0_i32_1 = arith.constant 0 : i32
    return %c0_i32, %c0_i32_0 : i32, i32
  }
  func.func @transform_2(%arg0: i32) -> (i32, i32) {
    %c0_i32 = arith.constant 0 : i32
    %c0_i32_0 = arith.constant 0 : i32
    %c0_i32_1 = arith.constant 0 : i32
    return %c0_i32, %c0_i32_0 : i32, i32
  }
  func.func @transform_3(%arg0: i32) -> (i32, i32) {
    %c0_i32 = arith.constant 0 : i32
    %c0_i32_0 = arith.constant 0 : i32
    %c0_i32_1 = arith.constant 0 : i32
    return %c0_i32, %c0_i32_0 : i32, i32
  }
  func.func @transform_4(%arg0: i32) -> (i32, i32) {
    %c0_i32 = arith.constant 0 : i32
    %c0_i32_0 = arith.constant 0 : i32
    %c0_i32_1 = arith.constant 0 : i32
    return %c0_i32, %c0_i32_0 : i32, i32
  }
  func.func @transform_5(%arg0: i32) -> (i32, i32) {
    %c0_i32 = arith.constant 0 : i32
    %c0_i32_0 = arith.constant 0 : i32
    return %arg0, %c0_i32 : i32, i32
  }
}

module attributes {stable_mosaic.version = 11 : i64} {
  func.func @_conv_linear_ce_kernel(%arg0: i32, %arg1: memref<48x864xbf16, #tpu.memory_space<vmem>>, %arg2: memref<48x1xi32, #tpu.memory_space<vmem>>, %arg3: memref<864x32xbf16, #tpu.memory_space<vmem>>, %arg4: memref<1x32xf32, #tpu.memory_space<vmem>>, %arg5: memref<32x256xbf16, #tpu.memory_space<vmem>>, %arg6: memref<1x256xf32, #tpu.memory_space<vmem>>, %arg7: memref<1x8x128xf32, #tpu.memory_space<vmem>>) attributes {dimension_semantics = [#tpu.dimension_semantics<parallel>], iteration_bounds = array<i64: 2>, scalar_prefetch = 0 : i64, scratch_operands = 0 : i64, tpu.core_type = #tpu.core_type<tc>, window_params = [{transform_indices = @transform_0, window_bounds = array<i64: 48, 864>}, {transform_indices = @transform_1, window_bounds = array<i64: 48, 1>}, {pipeline_mode = #tpu.pipeline_mode<synchronous>, transform_indices = @transform_2, window_bounds = array<i64: 864, 32>}, {pipeline_mode = #tpu.pipeline_mode<synchronous>, transform_indices = @transform_3, window_bounds = array<i64: 1, 32>}, {pipeline_mode = #tpu.pipeline_mode<synchronous>, transform_indices = @transform_4, window_bounds = array<i64: 32, 256>}, {pipeline_mode = #tpu.pipeline_mode<synchronous>, transform_indices = @transform_5, window_bounds = array<i64: 1, 256>}, {transform_indices = @transform_6, window_bounds = array<i64: 1, 8, 128>}]} {
    %c0 = arith.constant 0 : index
    %c0_0 = arith.constant 0 : index
    %0 = vector.load %arg1[%c0, %c0_0] : memref<48x864xbf16, #tpu.memory_space<vmem>>, vector<48x864xbf16>
    %c0_1 = arith.constant 0 : index
    %c0_2 = arith.constant 0 : index
    %1 = vector.load %arg3[%c0_1, %c0_2] : memref<864x32xbf16, #tpu.memory_space<vmem>>, vector<864x32xbf16>
    %cst = arith.constant dense<0.000000e+00> : vector<48x32xf32>
    %2 = tpu.matmul %0, %1, %cst {dimension_numbers = #tpu.dot_dimension_numbers<[1], [0], [0], [1], [0, 0, 1, 1], [], []>} : vector<48x864xbf16>, vector<864x32xbf16>, vector<48x32xf32> -> vector<48x32xf32>
    %c0_3 = arith.constant 0 : index
    %c0_4 = arith.constant 0 : index
    %3 = vector.load %arg4[%c0_3, %c0_4] : memref<1x32xf32, #tpu.memory_space<vmem>>, vector<1x32xf32>
    %4 = vector.broadcast %3 : vector<1x32xf32> to vector<48x32xf32>
    %5 = arith.addf %2, %4 : vector<48x32xf32>
    %cst_5 = arith.constant 0.000000e+00 : f32
    %6 = vector.broadcast %cst_5 : f32 to vector<48x32xf32>
    %7 = arith.cmpf oge, %5, %6 : vector<48x32xf32>
    %cst_6 = arith.constant 2.500000e-01 : f32
    %8 = vector.broadcast %cst_6 : f32 to vector<48x32xf32>
    %9 = arith.mulf %8, %5 : vector<48x32xf32>
    %10 = arith.select %7, %5, %9 : vector<48x32xi1>, vector<48x32xf32>
    %11 = arith.truncf %10 : vector<48x32xf32> to vector<48x32xbf16>
    %c0_7 = arith.constant 0 : index
    %c0_8 = arith.constant 0 : index
    %12 = vector.load %arg5[%c0_7, %c0_8] : memref<32x256xbf16, #tpu.memory_space<vmem>>, vector<32x256xbf16>
    %cst_9 = arith.constant dense<0.000000e+00> : vector<48x256xf32>
    %13 = tpu.matmul %11, %12, %cst_9 {dimension_numbers = #tpu.dot_dimension_numbers<[1], [0], [0], [1], [0, 0, 1, 1], [], []>} : vector<48x32xbf16>, vector<32x256xbf16>, vector<48x256xf32> -> vector<48x256xf32>
    %c0_10 = arith.constant 0 : index
    %c0_11 = arith.constant 0 : index
    %14 = vector.load %arg6[%c0_10, %c0_11] : memref<1x256xf32, #tpu.memory_space<vmem>>, vector<1x256xf32>
    %15 = vector.broadcast %14 : vector<1x256xf32> to vector<48x256xf32>
    %16 = arith.addf %13, %15 : vector<48x256xf32>
    %c0_12 = arith.constant 0 : index
    %c0_13 = arith.constant 0 : index
    %17 = vector.load %arg2[%c0_12, %c0_13] : memref<48x1xi32, #tpu.memory_space<vmem>>, vector<48x1xi32>
    %18 = tpu.iota {dimensions = array<i32: 1>} : vector<48x256xi32>
    %cst_14 = arith.constant dense<0xFF800000> : vector<48xf32>
    %19 = vector.multi_reduction <maximumf>, %16, %cst_14 [1] : vector<48x256xf32> to vector<48xf32>
    %20 = vector.shape_cast %19 : vector<48xf32> to vector<48x1xf32>
    %21 = vector.broadcast %20 : vector<48x1xf32> to vector<48x256xf32>
    %22 = arith.subf %16, %21 : vector<48x256xf32>
    %23 = math.exp %22 : vector<48x256xf32>
    %cst_15 = arith.constant dense<0.000000e+00> : vector<48xf32>
    %24 = vector.multi_reduction <add>, %23, %cst_15 [1] : vector<48x256xf32> to vector<48xf32>
    %25 = vector.shape_cast %24 : vector<48xf32> to vector<48x1xf32>
    %26 = math.log %25 : vector<48x1xf32>
    %27 = arith.addf %26, %20 : vector<48x1xf32>
    %28 = vector.broadcast %17 : vector<48x1xi32> to vector<48x256xi32>
    %29 = arith.cmpi eq, %18, %28 : vector<48x256xi32>
    %cst_16 = arith.constant 0.000000e+00 : f32
    %30 = vector.broadcast %cst_16 : f32 to vector<48x256xf32>
    %31 = arith.select %29, %16, %30 : vector<48x256xi1>, vector<48x256xf32>
    %cst_17 = arith.constant dense<0.000000e+00> : vector<48xf32>
    %32 = vector.multi_reduction <add>, %31, %cst_17 [1] : vector<48x256xf32> to vector<48xf32>
    %33 = vector.shape_cast %32 : vector<48xf32> to vector<48x1xf32>
    %c0_i32 = arith.constant 0 : i32
    %34 = vector.broadcast %c0_i32 : i32 to vector<48x1xi32>
    %35 = arith.cmpi sge, %17, %34 : vector<48x1xi32>
    %36 = arith.extui %35 : vector<48x1xi1> to vector<48x1xi32>
    %37 = arith.sitofp %36 : vector<48x1xi32> to vector<48x1xf32>
    %38 = arith.subf %27, %33 : vector<48x1xf32>
    %39 = arith.mulf %38, %37 : vector<48x1xf32>
    %40 = vector.shape_cast %39 : vector<48x1xf32> to vector<1x48x1xf32>
    %cst_18 = arith.constant dense<0.000000e+00> : vector<1xf32>
    %41 = vector.multi_reduction <add>, %40, %cst_18 [1, 2] : vector<1x48x1xf32> to vector<1xf32>
    %42 = vector.shape_cast %41 : vector<1xf32> to vector<1x1x1xf32>
    %43 = vector.extract %42[0, 0, 0] : f32 from vector<1x1x1xf32>
    %44 = vector.broadcast %43 : f32 to vector<1x8x128xf32>
    %c0_19 = arith.constant 0 : index
    %c0_20 = arith.constant 0 : index
    %c0_21 = arith.constant 0 : index
    %45 = vector.load %arg7[%c0_19, %c0_20, %c0_21] : memref<1x8x128xf32, #tpu.memory_space<vmem>>, vector<1x8x128xf32>
    tpu.vector_store %arg7[%c0_19, %c0_20, %c0_21], %44 {strides = array<i32>} : memref<1x8x128xf32, #tpu.memory_space<vmem>>, vector<1x8x128xf32>,
    return
  }
  func.func @transform_0(%arg0: i32) -> (i32, i32) {
    %c0_i32 = arith.constant 0 : i32
    %c0_i32_0 = arith.constant 0 : i32
    return %arg0, %c0_i32 : i32, i32
  }
  func.func @transform_1(%arg0: i32) -> (i32, i32) {
    %c0_i32 = arith.constant 0 : i32
    %c0_i32_0 = arith.constant 0 : i32
    return %arg0, %c0_i32 : i32, i32
  }
  func.func @transform_2(%arg0: i32) -> (i32, i32) {
    %c0_i32 = arith.constant 0 : i32
    %c0_i32_0 = arith.constant 0 : i32
    %c0_i32_1 = arith.constant 0 : i32
    return %c0_i32, %c0_i32_0 : i32, i32
  }
  func.func @transform_3(%arg0: i32) -> (i32, i32) {
    %c0_i32 = arith.constant 0 : i32
    %c0_i32_0 = arith.constant 0 : i32
    %c0_i32_1 = arith.constant 0 : i32
    return %c0_i32, %c0_i32_0 : i32, i32
  }
  func.func @transform_4(%arg0: i32) -> (i32, i32) {
    %c0_i32 = arith.constant 0 : i32
    %c0_i32_0 = arith.constant 0 : i32
    %c0_i32_1 = arith.constant 0 : i32
    return %c0_i32, %c0_i32_0 : i32, i32
  }
  func.func @transform_5(%arg0: i32) -> (i32, i32) {
    %c0_i32 = arith.constant 0 : i32
    %c0_i32_0 = arith.constant 0 : i32
    %c0_i32_1 = arith.constant 0 : i32
    return %c0_i32, %c0_i32_0 : i32, i32
  }
  func.func @transform_6(%arg0: i32) -> (i32, i32, i32) {
    %c0_i32 = arith.constant 0 : i32
    %c0_i32_0 = arith.constant 0 : i32
    %c0_i32_1 = arith.constant 0 : i32
    return %arg0, %c0_i32, %c0_i32_0 : i32, i32, i32
  }
}

</mosaic_0001>

<bundles_post_ra>
// kernel: one_scale_multistep_predictor_forward.5
= control target key start
LH: loop header
LB: loop body
LE: loop exit
PB: predicated region body
PF: predicated region fallthrough
CT: control target
= control target key end

     0   :  { %s357_s12 = smov 0   ;;  %s386_s0 = inlined_call_operand.vmem [shape: bf16[32,40], index: 0, kind: input, shape index: {}]   ;;  %s387_s1 = inlined_call_operand.vmem [shape: bf16[40,32], index: 1, kind: input, shape index: {}]   ;;  %s388_s2 = inlined_call_operand.vmem [shape: f32[1,32], index: 2, kind: input, shape index: {}]   ;;  %s389_s3 = inlined_call_operand.vmem [shape: f32[32,32], index: 3, kind: output, shape index: {}]  }
   0x1 LB: > { %s293_s13 = sadd.s32 4294967295, %s335_s12   ;;  %p297_p0 = scmp.ge.s32.totalorder %s335_s12, 1  ;;  %s335_s12 = sphi %s357_s12, %s13_s12  }
   0x2   : > { %p138_p1 = scmp.lt.s32.totalorder %s335_s12, 3 }
   0x4   : > { %p139_p2 = pnand %p297_p0, %p138_p1 }
   0x5   : > { %s298_s16 = sshll.u32 (!%p139_p2), %s293_s13, 1 }
   0x6   : > { %142 = sbr.rel (%p139_p2) target bundleno = 168 (0xa8), region = 32  ;;  %p163_p3 = scmp.lt.s32.totalorder (!%p139_p2), %s298_s16, 3 }
   0xb   : > { %v181_v0 = vld [vmem:[%s387_s1 + $0x10] sm:$0xf]  ;;  %vm210_vm0 = vcmask 1043456   ;;  %s391_s16 = smov (!%p163_p3, %s298_s16), 3  ;;  %v319_v4 = vld [vmem:[%s387_s1 + $0x8] sm:$0xff]  ;;  %v318_v5 = vld [vmem:[%s387_s1] sm:$0xff] }
   0xc   : > { %v200_v1 = vunpack.c.l.b16 %v181_v0  ;;  %s299_s19 = sshll.u32 %s391_s16, 2  ;;  %vm206_vm1 = vcmask 326656   ;;  %v328_v7 = vld [vmem:[%s388_s2] ss:$0 sm:$0xff]  ;;  %s301_s27 = sshll.u32 %s391_s16, 3  ;;  %vm234_vm3 = vcmask 261120  }
   0xd   : > { %s166_s24 = scalar_lea.vmem %s386_s0, %s299_s19  ;;  %s172_s30 = scalar_lea.vmem %s389_s3, %s301_s27 }
   0xe   : > { %v203_v2 = vpack.c.b16 %v200_v1, %v200_v1  ;;  %v317_v6 = vld [vmem:[%s166_s24] sm:$0xff] }
  0x10   : > { %v212_v3 = vsel %vm210_vm0, %v203_v2, 0 }
  0x11   : > { %219 = vmatpush.bf16.msra.mxu0 %v212_v3 }
  0x15   : > { %220 = vmatpush.bf16.msra.mxu0 %v319_v4 }
  0x19   : > { %221 = vmatpush.bf16.msra.mxu0 %v318_v5 }
  0x1c   : > { %314 = vmatmul.msk.bf16.vlgmr.msra.gmra.mxu0 %vm206_vm1, %v317_v6 }
  0x99   : > { %v223_v8 = vpop.f32.mrf.mxu0 }
  0x9a   : > { %v224_v9 = vadd.f32 %v328_v7, %v223_v8 }
  0x9c   : > { %vm228_vm2 = vcmp.ge.f32.partialorder %v224_v9, 0.0  ;;  %v230_v10 = vmul.f32 0.25, %v224_v9 }
  0x9e   : > { %v232_v11 = vsel %vm228_vm2, %v224_v9, %v230_v10 }
  0x9f   : > { %235 = vst.msk [vmem:[%s172_s30] sm:$0xff] %vm234_vm3, %v232_v11 }
  0xa1   : > { %v225_v12 = vpop.f32.mrf.mxu0 }
  0xa2   : > { %v226_v13 = vadd.f32 %v328_v7, %v225_v12 }
  0xa4   : > { %vm229_vm4 = vcmp.ge.f32.partialorder %v226_v13, 0.0  ;;  %v231_v14 = vmul.f32 0.25, %v226_v13 }
  0xa6   : > { %v233_v15 = vsel %vm229_vm4, %v226_v13, %v231_v14 }
  0xa7   : > { %236 = vst.msk [vmem:[%s172_s30 + $0x8] sm:$0xff] %vm234_vm3, %v233_v15 }
  0xa8 PF: > { %s13_s12 = sadd.s32 1, %s335_s12  }
  0xa9   : > { %p10_p4 = scmp.ge.s32.totalorder %s13_s12, 4  }
  0xab   :  { %12 = sbr.rel (!%p10_p4) target bundleno = 1 (0x1), region = 62 }

// kernel: one_scale_multistep_predictor_forward.7
= control target key start
LH: loop header
LB: loop body
LE: loop exit
PB: predicated region body
PF: predicated region fallthrough
CT: control target
= control target key end

     0   :  { %s1251_s15 = smov 0   ;;  %s1456_s0 = inlined_call_operand.vmem [shape: bf16[32,864], index: 0, kind: input, shape index: {}]   ;;  %s1457_s1 = inlined_call_operand.vmem [shape: bf16[864,32], index: 1, kind: input, shape index: {}]   ;;  %s1458_s2 = inlined_call_operand.vmem [shape: f32[1,32], index: 2, kind: input, shape index: {}]   ;;  %s1459_s3 = inlined_call_operand.vmem [shape: f32[32,32], index: 3, kind: input, shape index: {}]   ;;  %s1460_s4 = inlined_call_operand.vmem [shape: f32[32,32], index: 4, kind: output, shape index: {}]  }
   0x1 LB: > { %s889_s16 = sadd.s32 4294967295, %s1224_s15   ;;  %p893_p0 = scmp.ge.s32.totalorder %s1224_s15, 1  ;;  %s1224_s15 = sphi %s1251_s15, %s14_s15  }
   0x2   : > { %p175_p1 = scmp.lt.s32.totalorder %s1224_s15, 3 }
   0x4   : > { %p176_p2 = pnand %p893_p0, %p175_p1 }
   0x5   : > { %s894_s17 = sshll.u32 (!%p176_p2), %s889_s16, 1 }
   0x6   : > { %179 = sbr.rel (%p176_p2) target bundleno = 221 (0xdd), region = 36  ;;  %p208_p3 = scmp.lt.s32.totalorder (!%p176_p2), %s894_s17, 3 }
   0xb   : > { %v1161_v0 = vld [vmem:[%s1457_s1 + $0x38] sm:$0xff]  ;;  %v1160_v3 = vld [vmem:[%s1457_s1 + $0x30] sm:$0xff]  ;;  %v1159_v8 = vld [vmem:[%s1457_s1 + $0x28] sm:$0xff]  ;;  %s1462_s17 = smov (!%p208_p3, %s894_s17), 3  ;;  %vm706_vm0 = vcmask 785408   ;;  %vm818_vm2 = vcmask 261120  }
   0xc   : > { %v1169_v1 = vld [vmem:[%s1457_s1 + $0x78] sm:$0xff]  ;;  %710 = vmatpush.bf16.msra.mxu0 %v1161_v0  ;;  %v1168_v4 = vld [vmem:[%s1457_s1 + $0x70] sm:$0xff]  ;;  %v1167_v9 = vld [vmem:[%s1457_s1 + $0x68] sm:$0xff]  ;;  %s1208_s13 = smul.u32 28, %s1462_s17 }
   0xd   : > { %v1177_v2 = vld [vmem:[%s1457_s1 + $0xb8] sm:$0xff]  ;;  %724 = vmatpush.bf16.msra.mxu1 %v1169_v1  ;;  %v1176_v6 = vld [vmem:[%s1457_s1 + $0xb0] sm:$0xff]  ;;  %v1175_v10 = vld [vmem:[%s1457_s1 + $0xa8] sm:$0xff] }
   0xe   : > { %v1185_v5 = vld [vmem:[%s1457_s1 + $0xf8] sm:$0xff]  ;;  %738 = vmatpush.bf16.msra.mxu2 %v1177_v2  ;;  %v1184_v7 = vld [vmem:[%s1457_s1 + $0xf0] sm:$0xff]  ;;  %v1183_v11 = vld [vmem:[%s1457_s1 + $0xe8] sm:$0xff]  ;;  %s1346_s26 = scalar_lea.vmem %s1456_s0, %s1208_s13 }
   0xf   : > { %752 = vmatpush.bf16.msra.mxu3 %v1185_v5  ;;  %v1158_v12 = vld [vmem:[%s1457_s1 + $0x20] sm:$0xff]  ;;  %v1157_v16 = vld [vmem:[%s1457_s1 + $0x18] sm:$0xff]  ;;  %v1156_v20 = vld [vmem:[%s1457_s1 + $0x10] sm:$0xff] }
  0x10   : > { %711 = vmatpush.bf16.msra.mxu0 %v1160_v3  ;;  %v1166_v13 = vld [vmem:[%s1457_s1 + $0x60] sm:$0xff]  ;;  %v1165_v17 = vld [vmem:[%s1457_s1 + $0x58] sm:$0xff]  ;;  %v1164_v21 = vld [vmem:[%s1457_s1 + $0x50] sm:$0xff] }
  0x11   : > { %725 = vmatpush.bf16.msra.mxu1 %v1168_v4  ;;  %v1174_v14 = vld [vmem:[%s1457_s1 + $0xa0] sm:$0xff]  ;;  %v1173_v18 = vld [vmem:[%s1457_s1 + $0x98] sm:$0xff]  ;;  %v1172_v22 = vld [vmem:[%s1457_s1 + $0x90] sm:$0xff] }
  0x12   : > { %739 = vmatpush.bf16.msra.mxu2 %v1176_v6  ;;  %v1182_v15 = vld [vmem:[%s1457_s1 + $0xe0] sm:$0xff]  ;;  %v1181_v19 = vld [vmem:[%s1457_s1 + $0xd8] sm:$0xff]  ;;  %v1180_v23 = vld [vmem:[%s1457_s1 + $0xd0] sm:$0xff] }
  0x13   : > { %753 = vmatpush.bf16.msra.mxu3 %v1184_v7  ;;  %v1155_v24 = vld [vmem:[%s1457_s1 + $0x8] sm:$0xff]  ;;  %v1154_v27 = vld [vmem:[%s1457_s1] sm:$0xff]  ;;  %v1193_v31 = vld [vmem:[%s1457_s1 + $0x138] sm:$0xff] }
  0x14   : > { %712 = vmatpush.bf16.msra.mxu0 %v1159_v8  ;;  %v1163_v25 = vld [vmem:[%s1457_s1 + $0x48] sm:$0xff]  ;;  %v1162_v29 = vld [vmem:[%s1457_s1 + $0x40] sm:$0xff]  ;;  %v1150_v34 = vld [vmem:[%s1346_s26 + $0x18] sm:$0xf0] }
  0x15   : > { %726 = vmatpush.bf16.msra.mxu1 %v1167_v9  ;;  %v1171_v26 = vld [vmem:[%s1457_s1 + $0x88] sm:$0xff]  ;;  %v1170_v30 = vld [vmem:[%s1457_s1 + $0x80] sm:$0xff]  ;;  %v1201_v38 = vld [vmem:[%s1457_s1 + $0x178] sm:$0xff] }
  0x16   : > { %740 = vmatpush.bf16.msra.mxu2 %v1175_v10  ;;  %v1179_v28 = vld [vmem:[%s1457_s1 + $0xc8] sm:$0xff]  ;;  %v902_v33 = vld [vmem:[%s1346_s26] sm:$0xf]  ;;  %v1151_v35 = vld [vmem:[%s1346_s26 + $0x20] sm:$0xf0] }
  0x17   : > { %754 = vmatpush.bf16.msra.mxu3 %v1183_v11  ;;  %v910_v32 = vld [vmem:[%s1346_s26 + $0x8] sm:$0xf]  ;;  %v1147_v36 = vld [vmem:[%s1346_s26 + $0x4] sm:$0xf]  ;;  %v904_v37 = vld [vmem:[%s1346_s26 + $0x1c] sm:$0xf0]  ;;  %v903_v41 = vor.u32 %v1150_v34, %v902_v33 }
  0x18   : > { %713 = vmatpush.bf16.msra.mxu0 %v1158_v12  ;;  %v1207_v39 = vld [vmem:[%s1457_s1 + $0x1a8] sm:$0xff]  ;;  %v1178_v40 = vld [vmem:[%s1457_s1 + $0xc0] sm:$0xff]  ;;  %v911_v42 = vor.u32 %v1151_v35, %v910_v32  ;;  %v907_v45 = vor.u32 %v1147_v36, %v904_v37  ;;  %v1192_v46 = vld [vmem:[%s1457_s1 + $0x130] sm:$0xff] }
  0x19   : > { %727 = vmatpush.bf16.msra.mxu1 %v1166_v13  ;;  %v1148_v43 = vld [vmem:[%s1346_s26 + $0xc] sm:$0xf]  ;;  %v912_v44 = vld [vmem:[%s1346_s26 + $0x24] sm:$0xf0]  ;;  %v1200_v47 = vld [vmem:[%s1457_s1 + $0x170] sm:$0xff] }
  0x1a   : > { %741 = vmatpush.bf16.msra.mxu2 %v1174_v14  ;;  %v1206_v48 = vld [vmem:[%s1457_s1 + $0x1a0] sm:$0xff]  ;;  %v915_v49 = vor.u32 %v1148_v43, %v912_v44  ;;  %v1191_v50 = vld [vmem:[%s1457_s1 + $0x128] sm:$0xff]  ;;  %v1205_v52 = vld [vmem:[%s1457_s1 + $0x198] sm:$0xff] }
  0x1b   : > { %755 = vmatpush.bf16.msra.mxu3 %v1182_v15  ;;  %v1199_v51 = vld [vmem:[%s1457_s1 + $0x168] sm:$0xff]  ;;  %v1190_v53 = vld [vmem:[%s1457_s1 + $0x120] sm:$0xff]  ;;  %v1204_v55 = vld [vmem:[%s1457_s1 + $0x190] sm:$0xff] }
  0x1c   : > { %714 = vmatpush.bf16.msra.mxu0 %v1157_v16  ;;  %v1198_v54 = vld [vmem:[%s1457_s1 + $0x160] sm:$0xff]  ;;  %v1189_v56 = vld [vmem:[%s1457_s1 + $0x118] sm:$0xff]  ;;  %v1203_v58 = vld [vmem:[%s1457_s1 + $0x188] sm:$0xff] }
  0x1d   : > { %728 = vmatpush.bf16.msra.mxu1 %v1165_v17  ;;  %v1197_v57 = vld [vmem:[%s1457_s1 + $0x158] sm:$0xff]  ;;  %v1188_v59 = vld [vmem:[%s1457_s1 + $0x110] sm:$0xff]  ;;  %v1202_v61 = vld [vmem:[%s1457_s1 + $0x180] sm:$0xff] }
  0x1e   : > { %742 = vmatpush.bf16.msra.mxu2 %v1173_v18  ;;  %v1196_v60 = vld [vmem:[%s1457_s1 + $0x150] sm:$0xff]  ;;  %v926_v62 = vld [vmem:[%s1346_s26 + $0x18] sm:$0xf]  ;;  %v1187_v1 = vld [vmem:[%s1457_s1 + $0x108] sm:$0xff] }
  0x1f   : > { %756 = vmatpush.bf16.msra.mxu3 %v1181_v19  ;;  %v1153_v63 = vld [vmem:[%s1346_s26 + $0x30] sm:$0xf0]  ;;  %v1195_v2 = vld [vmem:[%s1457_s1 + $0x148] sm:$0xff]  ;;  %v1186_v3 = vld [vmem:[%s1457_s1 + $0x100] sm:$0xff] }
  0x20   : > { %715 = vmatpush.bf16.msra.mxu0 %v1156_v20  ;;  %v927_v0 = vor.u32 %v1153_v63, %v926_v62  ;;  %v918_v4 = vld [vmem:[%s1346_s26 + $0x10] sm:$0xf]  ;;  %v1152_v5 = vld [vmem:[%s1346_s26 + $0x28] sm:$0xf0]  ;;  %v1194_v6 = vld [vmem:[%s1457_s1 + $0x140] sm:$0xff] }
  0x21   : > { %729 = vmatpush.bf16.msra.mxu1 %v1164_v21  ;;  %v1149_v7 = vld [vmem:[%s1346_s26 + $0x14] sm:$0xf]  ;;  %v920_v8 = vld [vmem:[%s1346_s26 + $0x2c] sm:$0xf0]  ;;  %v919_v9 = vor.u32 %v1152_v5, %v918_v4  ;;  %v1217_v12 = vld [vmem:[%s1458_s2] ss:$0 sm:$0xff] }
  0x22   : > { %743 = vmatpush.bf16.msra.mxu2 %v1172_v22  ;;  %v923_v10 = vor.u32 %v1149_v7, %v920_v8  ;;  %s897_s26 = sshll.u32 %s1462_s17, 3 }
  0x23   : > { %757 = vmatpush.bf16.msra.mxu3 %v1180_v23  ;;  %s218_s13 = scalar_lea.vmem %s1459_s3, %s897_s26  ;;  %s224_s18 = scalar_lea.vmem %s1460_s4, %s897_s26 }
  0x24   : > { %716 = vmatpush.bf16.msra.mxu0 %v1155_v24  ;;  %v808_v32 = vld [vmem:[%s218_s13] sm:$0xff]  ;;  %v809_v43 = vld [vmem:[%s218_s13 + $0x8] sm:$0xff] }
  0x25   : > { %730 = vmatpush.bf16.msra.mxu1 %v1163_v25 }
  0x26   : > { %744 = vmatpush.bf16.msra.mxu2 %v1171_v26 }
  0x27   : > { %758 = vmatpush.bf16.msra.mxu3 %v1179_v28 }
  0x28   : > { %717 = vmatpush.bf16.msra.mxu0 %v1154_v27 }
  0x29   : > { %731 = vmatpush.bf16.msra.mxu1 %v1162_v29 }
  0x2a   : > { %745 = vmatpush.bf16.msra.mxu2 %v1170_v30 }
  0x2b   : > { %759 = vmatpush.bf16.msra.mxu3 %v1178_v40  ;;  %718 = vmatmul.bf16.vlgmr.msra.gmra.mxu0 %v903_v41 }
  0x2c   : > { %766 = vmatpush.bf16.msrb.mxu0 %v1193_v31  ;;  %732 = vmatmul.bf16.vlgmr.msra.gmra.mxu1 %v907_v45 }
  0x2d   : > { %780 = vmatpush.bf16.msrb.mxu1 %v1201_v38  ;;  %746 = vmatmul.bf16.vlgmr.msra.gmra.mxu2 %v911_v42 }
  0x2e   : > { %796 = vmatpush.bf16.msrb.mxu2 %v1207_v39  ;;  %760 = vmatmul.bf16.vlgmr.msra.gmra.mxu3 %v915_v49 }
  0x30   : > { %767 = vmatpush.bf16.msrb.mxu0 %v1192_v46 }
  0x31   : > { %781 = vmatpush.bf16.msrb.mxu1 %v1200_v47 }
  0x32   : > { %797 = vmatpush.bf16.msrb.mxu2 %v1206_v48 }
  0x34   : > { %768 = vmatpush.bf16.msrb.mxu0 %v1191_v50 }
  0x35   : > { %782 = vmatpush.bf16.msrb.mxu1 %v1199_v51 }
  0x36   : > { %798 = vmatpush.bf16.msrb.mxu2 %v1205_v52 }
  0x38   : > { %769 = vmatpush.bf16.msrb.mxu0 %v1190_v53 }
  0x39   : > { %783 = vmatpush.bf16.msrb.mxu1 %v1198_v54 }
  0x3a   : > { %799 = vmatpush.bf16.msrb.mxu2 %v1204_v55 }
  0x3c   : > { %770 = vmatpush.bf16.msrb.mxu0 %v1189_v56 }
  0x3d   : > { %784 = vmatpush.bf16.msrb.mxu1 %v1197_v57 }
  0x3e   : > { %800 = vmatpush.bf16.msrb.mxu2 %v1203_v58 }
  0x40   : > { %771 = vmatpush.bf16.msrb.mxu0 %v1188_v59 }
  0x41   : > { %785 = vmatpush.bf16.msrb.mxu1 %v1196_v60 }
  0x42   : > { %801 = vmatpush.bf16.msrb.mxu2 %v1202_v61 }
  0x44   : > { %772 = vmatpush.bf16.msrb.mxu0 %v1187_v1 }
  0x45   : > { %1144 = vmatmul.msk.bf16.vlgmr.msrb.gmra.mxu2 %vm706_vm0, %v927_v0  ;;  %786 = vmatpush.bf16.msrb.mxu1 %v1195_v2 }
  0x48   : > { %773 = vmatpush.bf16.msrb.mxu0 %v1186_v3 }
  0x49   : > { %787 = vmatpush.bf16.msrb.mxu1 %v1194_v6 }
  0x4b   : > { %774 = vmatmul.bf16.vlgmr.msrb.gmra.mxu0 %v919_v9 }
  0x4c   : > { %788 = vmatmul.bf16.vlgmr.msrb.gmra.mxu1 %v923_v10 }
  0xa8   : > { %v719_v11 = vpop.f32.mrf.mxu0 }
  0xa9   : > { %v733_v13 = vpop.f32.mrf.mxu1  ;;  %v720_v15 = vadd.f32 %v1217_v12, %v719_v11 }
  0xab   : > { %v734_v16 = vadd.f32 %v733_v13, %v720_v15 }
  0xb0   : > { %v747_v14 = vpop.f32.mrf.mxu2  ;;  %v721_v17 = vpop.f32.mrf.mxu0 }
  0xb1   : > { %v735_v18 = vpop.f32.mrf.mxu1  ;;  %v761_v19 = vpop.f32.mrf.mxu3  ;;  %v748_v21 = vadd.f32 %v747_v14, %v734_v16  ;;  %v722_v22 = vadd.f32 %v1217_v12, %v721_v17 }
  0xb3   : > { %v762_v23 = vadd.f32 %v761_v19, %v748_v21  ;;  %v736_v24 = vadd.f32 %v735_v18, %v722_v22 }
  0xb8   : > { %v749_v20 = vpop.f32.mrf.mxu2 }
  0xb9   : > { %v750_v29 = vadd.f32 %v749_v20, %v736_v24  ;;  %v763_v31 = vpop.f32.mrf.mxu3 }
  0xbb   : > { %v764_v34 = vadd.f32 %v763_v31, %v750_v29 }
  0xc8   : > { %v775_v25 = vpop.f32.mrf.mxu0  ;;  %v803_v28 = vpop.f32.mrf.mxu2 }
  0xc9   : > { %v776_v26 = vadd.f32 %v775_v25, %v762_v23  ;;  %v789_v27 = vpop.f32.mrf.mxu1 }
  0xcb   : > { %v790_v30 = vadd.f32 %v789_v27, %v776_v26 }
  0xcd   : > { %v804_v33 = vadd.f32 %v803_v28, %v790_v30 }
  0xcf   : > { %v810_v35 = vadd.f32 %v808_v32, %v804_v33 }
  0xd0   : > { %v777_v36 = vpop.f32.mrf.mxu0  ;;  %v805_v42 = vpop.f32.mrf.mxu2 }
  0xd1   : > { %vm812_vm1 = vcmp.ge.f32.partialorder %v810_v35, 0.0  ;;  %v814_v37 = vmul.f32 0.25, %v810_v35  ;;  %v778_v38 = vadd.f32 %v777_v36, %v764_v34  ;;  %v791_v39 = vpop.f32.mrf.mxu1 }
  0xd3   : > { %v816_v40 = vsel %vm812_vm1, %v810_v35, %v814_v37  ;;  %v792_v41 = vadd.f32 %v791_v39, %v778_v38 }
  0xd4   : > { %819 = vst.msk [vmem:[%s224_s18] sm:$0xff] %vm818_vm2, %v816_v40 }
  0xd5   : > { %v806_v44 = vadd.f32 %v805_v42, %v792_v41 }
  0xd7   : > { %v811_v45 = vadd.f32 %v809_v43, %v806_v44 }
  0xd9   : > { %vm813_vm3 = vcmp.ge.f32.partialorder %v811_v45, 0.0  ;;  %v815_v46 = vmul.f32 0.25, %v811_v45 }
  0xdb   : > { %v817_v47 = vsel %vm813_vm3, %v811_v45, %v815_v46 }
  0xdc   : > { %820 = vst.msk [vmem:[%s224_s18 + $0x8] sm:$0xff] %vm818_vm2, %v817_v47 }
  0xdd PF: > { %s14_s15 = sadd.s32 1, %s1224_s15  }
  0xde   : > { %p11_p4 = scmp.ge.s32.totalorder %s14_s15, 4  }
  0xe0   :  { %13 = sbr.rel (!%p11_p4) target bundleno = 1 (0x1), region = 69 }

// kernel: one_scale_multistep_predictor_forward.6
= control target key start
LH: loop header
LB: loop body
LE: loop exit
PB: predicated region body
PF: predicated region fallthrough
CT: control target
= control target key end

     0   :  { %s1181_s12 = smov 0   ;;  %s1383_s0 = inlined_call_operand.vmem [shape: bf16[32,864], index: 0, kind: input, shape index: {}]   ;;  %s1384_s1 = inlined_call_operand.vmem [shape: bf16[864,32], index: 1, kind: input, shape index: {}]   ;;  %s1385_s2 = inlined_call_operand.vmem [shape: f32[1,32], index: 2, kind: input, shape index: {}]   ;;  %s1386_s3 = inlined_call_operand.vmem [shape: bf16[32,32], index: 3, kind: output, shape index: {}]  }
   0x1 LB: > { %s826_s13 = sadd.s32 4294967295, %s1159_s12   ;;  %p830_p0 = scmp.ge.s32.totalorder %s1159_s12, 1  ;;  %s1159_s12 = sphi %s1181_s12, %s13_s12  }
   0x2   : > { %p139_p1 = scmp.lt.s32.totalorder %s1159_s12, 3 }
   0x4   : > { %p140_p2 = pnand %p830_p0, %p139_p1 }
   0x5   : > { %s831_s11 = sshll.u32 (!%p140_p2), %s826_s13, 1 }
   0x6   : > { %143 = sbr.rel (%p140_p2) target bundleno = 221 (0xdd), region = 32  ;;  %p165_p3 = scmp.lt.s32.totalorder (!%p140_p2), %s831_s11, 3 }
   0xb   : > { %v1096_v0 = vld [vmem:[%s1384_s1 + $0x38] sm:$0xff]  ;;  %v1095_v3 = vld [vmem:[%s1384_s1 + $0x30] sm:$0xff]  ;;  %v1094_v8 = vld [vmem:[%s1384_s1 + $0x28] sm:$0xff]  ;;  %s1388_s11 = smov (!%p165_p3, %s831_s11), 3  ;;  %vm657_vm0 = vcmask 785408   ;;  %vm767_vm2 = vcmask 257024  }
   0xc   : > { %v1104_v1 = vld [vmem:[%s1384_s1 + $0x78] sm:$0xff]  ;;  %661 = vmatpush.bf16.msra.mxu0 %v1096_v0  ;;  %v1103_v4 = vld [vmem:[%s1384_s1 + $0x70] sm:$0xff]  ;;  %v1102_v9 = vld [vmem:[%s1384_s1 + $0x68] sm:$0xff]  ;;  %s1143_s8 = smul.u32 28, %s1388_s11 }
   0xd   : > { %v1112_v2 = vld [vmem:[%s1384_s1 + $0xb8] sm:$0xff]  ;;  %675 = vmatpush.bf16.msra.mxu1 %v1104_v1  ;;  %v1111_v6 = vld [vmem:[%s1384_s1 + $0xb0] sm:$0xff]  ;;  %v1110_v10 = vld [vmem:[%s1384_s1 + $0xa8] sm:$0xff] }
   0xe   : > { %v1120_v5 = vld [vmem:[%s1384_s1 + $0xf8] sm:$0xff]  ;;  %689 = vmatpush.bf16.msra.mxu2 %v1112_v2  ;;  %v1119_v7 = vld [vmem:[%s1384_s1 + $0xf0] sm:$0xff]  ;;  %v1118_v11 = vld [vmem:[%s1384_s1 + $0xe8] sm:$0xff]  ;;  %s1276_s13 = scalar_lea.vmem %s1383_s0, %s1143_s8 }
   0xf   : > { %703 = vmatpush.bf16.msra.mxu3 %v1120_v5  ;;  %v1093_v12 = vld [vmem:[%s1384_s1 + $0x20] sm:$0xff]  ;;  %v1092_v16 = vld [vmem:[%s1384_s1 + $0x18] sm:$0xff]  ;;  %v1091_v20 = vld [vmem:[%s1384_s1 + $0x10] sm:$0xff] }
  0x10   : > { %662 = vmatpush.bf16.msra.mxu0 %v1095_v3  ;;  %v1101_v13 = vld [vmem:[%s1384_s1 + $0x60] sm:$0xff]  ;;  %v1100_v17 = vld [vmem:[%s1384_s1 + $0x58] sm:$0xff]  ;;  %v1099_v21 = vld [vmem:[%s1384_s1 + $0x50] sm:$0xff] }
  0x11   : > { %676 = vmatpush.bf16.msra.mxu1 %v1103_v4  ;;  %v1109_v14 = vld [vmem:[%s1384_s1 + $0xa0] sm:$0xff]  ;;  %v1108_v18 = vld [vmem:[%s1384_s1 + $0x98] sm:$0xff]  ;;  %v1107_v22 = vld [vmem:[%s1384_s1 + $0x90] sm:$0xff] }
  0x12   : > { %690 = vmatpush.bf16.msra.mxu2 %v1111_v6  ;;  %v1117_v15 = vld [vmem:[%s1384_s1 + $0xe0] sm:$0xff]  ;;  %v1116_v19 = vld [vmem:[%s1384_s1 + $0xd8] sm:$0xff]  ;;  %v1115_v23 = vld [vmem:[%s1384_s1 + $0xd0] sm:$0xff] }
  0x13   : > { %704 = vmatpush.bf16.msra.mxu3 %v1119_v7  ;;  %v1090_v24 = vld [vmem:[%s1384_s1 + $0x8] sm:$0xff]  ;;  %v1089_v27 = vld [vmem:[%s1384_s1] sm:$0xff]  ;;  %v1128_v31 = vld [vmem:[%s1384_s1 + $0x138] sm:$0xff] }
  0x14   : > { %663 = vmatpush.bf16.msra.mxu0 %v1094_v8  ;;  %v1098_v25 = vld [vmem:[%s1384_s1 + $0x48] sm:$0xff]  ;;  %v1097_v29 = vld [vmem:[%s1384_s1 + $0x40] sm:$0xff]  ;;  %v1085_v34 = vld [vmem:[%s1276_s13 + $0x18] sm:$0xf0] }
  0x15   : > { %677 = vmatpush.bf16.msra.mxu1 %v1102_v9  ;;  %v1106_v26 = vld [vmem:[%s1384_s1 + $0x88] sm:$0xff]  ;;  %v1105_v30 = vld [vmem:[%s1384_s1 + $0x80] sm:$0xff]  ;;  %v1136_v38 = vld [vmem:[%s1384_s1 + $0x178] sm:$0xff] }
  0x16   : > { %691 = vmatpush.bf16.msra.mxu2 %v1110_v10  ;;  %v1114_v28 = vld [vmem:[%s1384_s1 + $0xc8] sm:$0xff]  ;;  %v837_v33 = vld [vmem:[%s1276_s13] sm:$0xf]  ;;  %v1086_v35 = vld [vmem:[%s1276_s13 + $0x20] sm:$0xf0] }
  0x17   : > { %705 = vmatpush.bf16.msra.mxu3 %v1118_v11  ;;  %v845_v32 = vld [vmem:[%s1276_s13 + $0x8] sm:$0xf]  ;;  %v1082_v36 = vld [vmem:[%s1276_s13 + $0x4] sm:$0xf]  ;;  %v839_v37 = vld [vmem:[%s1276_s13 + $0x1c] sm:$0xf0]  ;;  %v838_v41 = vor.u32 %v1085_v34, %v837_v33 }
  0x18   : > { %664 = vmatpush.bf16.msra.mxu0 %v1093_v12  ;;  %v1142_v39 = vld [vmem:[%s1384_s1 + $0x1a8] sm:$0xff]  ;;  %v1113_v40 = vld [vmem:[%s1384_s1 + $0xc0] sm:$0xff]  ;;  %v846_v42 = vor.u32 %v1086_v35, %v845_v32  ;;  %v842_v45 = vor.u32 %v1082_v36, %v839_v37  ;;  %v1127_v46 = vld [vmem:[%s1384_s1 + $0x130] sm:$0xff] }
  0x19   : > { %678 = vmatpush.bf16.msra.mxu1 %v1101_v13  ;;  %v1083_v43 = vld [vmem:[%s1276_s13 + $0xc] sm:$0xf]  ;;  %v847_v44 = vld [vmem:[%s1276_s13 + $0x24] sm:$0xf0]  ;;  %v1135_v47 = vld [vmem:[%s1384_s1 + $0x170] sm:$0xff] }
  0x1a   : > { %692 = vmatpush.bf16.msra.mxu2 %v1109_v14  ;;  %v1141_v48 = vld [vmem:[%s1384_s1 + $0x1a0] sm:$0xff]  ;;  %v850_v49 = vor.u32 %v1083_v43, %v847_v44  ;;  %v1126_v50 = vld [vmem:[%s1384_s1 + $0x128] sm:$0xff]  ;;  %v1140_v52 = vld [vmem:[%s1384_s1 + $0x198] sm:$0xff] }
  0x1b   : > { %706 = vmatpush.bf16.msra.mxu3 %v1117_v15  ;;  %v1134_v51 = vld [vmem:[%s1384_s1 + $0x168] sm:$0xff]  ;;  %v1125_v53 = vld [vmem:[%s1384_s1 + $0x120] sm:$0xff]  ;;  %v1139_v55 = vld [vmem:[%s1384_s1 + $0x190] sm:$0xff] }
  0x1c   : > { %665 = vmatpush.bf16.msra.mxu0 %v1092_v16  ;;  %v1133_v54 = vld [vmem:[%s1384_s1 + $0x160] sm:$0xff]  ;;  %v1124_v56 = vld [vmem:[%s1384_s1 + $0x118] sm:$0xff]  ;;  %v1138_v58 = vld [vmem:[%s1384_s1 + $0x188] sm:$0xff] }
  0x1d   : > { %679 = vmatpush.bf16.msra.mxu1 %v1100_v17  ;;  %v1132_v57 = vld [vmem:[%s1384_s1 + $0x158] sm:$0xff]  ;;  %v1123_v59 = vld [vmem:[%s1384_s1 + $0x110] sm:$0xff]  ;;  %v1137_v61 = vld [vmem:[%s1384_s1 + $0x180] sm:$0xff] }
  0x1e   : > { %693 = vmatpush.bf16.msra.mxu2 %v1108_v18  ;;  %v1131_v60 = vld [vmem:[%s1384_s1 + $0x150] sm:$0xff]  ;;  %v861_v62 = vld [vmem:[%s1276_s13 + $0x18] sm:$0xf]  ;;  %v1122_v1 = vld [vmem:[%s1384_s1 + $0x108] sm:$0xff] }
  0x1f   : > { %707 = vmatpush.bf16.msra.mxu3 %v1116_v19  ;;  %v1088_v63 = vld [vmem:[%s1276_s13 + $0x30] sm:$0xf0]  ;;  %v1130_v2 = vld [vmem:[%s1384_s1 + $0x148] sm:$0xff]  ;;  %v1121_v3 = vld [vmem:[%s1384_s1 + $0x100] sm:$0xff] }
  0x20   : > { %666 = vmatpush.bf16.msra.mxu0 %v1091_v20  ;;  %v862_v0 = vor.u32 %v1088_v63, %v861_v62  ;;  %v853_v4 = vld [vmem:[%s1276_s13 + $0x10] sm:$0xf]  ;;  %v1087_v5 = vld [vmem:[%s1276_s13 + $0x28] sm:$0xf0]  ;;  %v1129_v6 = vld [vmem:[%s1384_s1 + $0x140] sm:$0xff] }
  0x21   : > { %680 = vmatpush.bf16.msra.mxu1 %v1099_v21  ;;  %v1084_v7 = vld [vmem:[%s1276_s13 + $0x14] sm:$0xf]  ;;  %v855_v8 = vld [vmem:[%s1276_s13 + $0x2c] sm:$0xf0]  ;;  %v854_v9 = vor.u32 %v1087_v5, %v853_v4  ;;  %v1152_v12 = vld [vmem:[%s1385_s2] ss:$0 sm:$0xff] }
  0x22   : > { %694 = vmatpush.bf16.msra.mxu2 %v1107_v22  ;;  %v858_v10 = vor.u32 %v1084_v7, %v855_v8  ;;  %s834_s13 = sshll.u32 %s1388_s11, 2 }
  0x23   : > { %708 = vmatpush.bf16.msra.mxu3 %v1115_v23  ;;  %s175_s5 = scalar_lea.vmem %s1386_s3, %s834_s13 }
  0x24   : > { %667 = vmatpush.bf16.msra.mxu0 %v1090_v24 }
  0x25   : > { %681 = vmatpush.bf16.msra.mxu1 %v1098_v25 }
  0x26   : > { %695 = vmatpush.bf16.msra.mxu2 %v1106_v26 }
  0x27   : > { %709 = vmatpush.bf16.msra.mxu3 %v1114_v28 }
  0x28   : > { %668 = vmatpush.bf16.msra.mxu0 %v1089_v27 }
  0x29   : > { %682 = vmatpush.bf16.msra.mxu1 %v1097_v29 }
  0x2a   : > { %696 = vmatpush.bf16.msra.mxu2 %v1105_v30 }
  0x2b   : > { %710 = vmatpush.bf16.msra.mxu3 %v1113_v40  ;;  %669 = vmatmul.bf16.vlgmr.msra.gmra.mxu0 %v838_v41 }
  0x2c   : > { %717 = vmatpush.bf16.msrb.mxu0 %v1128_v31  ;;  %683 = vmatmul.bf16.vlgmr.msra.gmra.mxu1 %v842_v45 }
  0x2d   : > { %731 = vmatpush.bf16.msrb.mxu1 %v1136_v38  ;;  %697 = vmatmul.bf16.vlgmr.msra.gmra.mxu2 %v846_v42 }
  0x2e   : > { %747 = vmatpush.bf16.msrb.mxu2 %v1142_v39  ;;  %711 = vmatmul.bf16.vlgmr.msra.gmra.mxu3 %v850_v49 }
  0x30   : > { %718 = vmatpush.bf16.msrb.mxu0 %v1127_v46 }
  0x31   : > { %732 = vmatpush.bf16.msrb.mxu1 %v1135_v47 }
  0x32   : > { %748 = vmatpush.bf16.msrb.mxu2 %v1141_v48 }
  0x34   : > { %719 = vmatpush.bf16.msrb.mxu0 %v1126_v50 }
  0x35   : > { %733 = vmatpush.bf16.msrb.mxu1 %v1134_v51 }
  0x36   : > { %749 = vmatpush.bf16.msrb.mxu2 %v1140_v52 }
  0x38   : > { %720 = vmatpush.bf16.msrb.mxu0 %v1125_v53 }
  0x39   : > { %734 = vmatpush.bf16.msrb.mxu1 %v1133_v54 }
  0x3a   : > { %750 = vmatpush.bf16.msrb.mxu2 %v1139_v55 }
  0x3c   : > { %721 = vmatpush.bf16.msrb.mxu0 %v1124_v56 }
  0x3d   : > { %735 = vmatpush.bf16.msrb.mxu1 %v1132_v57 }
  0x3e   : > { %751 = vmatpush.bf16.msrb.mxu2 %v1138_v58 }
  0x40   : > { %722 = vmatpush.bf16.msrb.mxu0 %v1123_v59 }
  0x41   : > { %736 = vmatpush.bf16.msrb.mxu1 %v1131_v60 }
  0x42   : > { %752 = vmatpush.bf16.msrb.mxu2 %v1137_v61 }
  0x44   : > { %723 = vmatpush.bf16.msrb.mxu0 %v1122_v1 }
  0x45   : > { %1079 = vmatmul.msk.bf16.vlgmr.msrb.gmra.mxu2 %vm657_vm0, %v862_v0  ;;  %737 = vmatpush.bf16.msrb.mxu1 %v1130_v2 }
  0x48   : > { %724 = vmatpush.bf16.msrb.mxu0 %v1121_v3 }
  0x49   : > { %738 = vmatpush.bf16.msrb.mxu1 %v1129_v6 }
  0x4b   : > { %725 = vmatmul.bf16.vlgmr.msrb.gmra.mxu0 %v854_v9 }
  0x4c   : > { %739 = vmatmul.bf16.vlgmr.msrb.gmra.mxu1 %v858_v10 }
  0xa8   : > { %v670_v11 = vpop.f32.mrf.mxu0 }
  0xa9   : > { %v684_v13 = vpop.f32.mrf.mxu1  ;;  %v671_v15 = vadd.f32 %v1152_v12, %v670_v11 }
  0xab   : > { %v685_v16 = vadd.f32 %v684_v13, %v671_v15 }
  0xb0   : > { %v698_v14 = vpop.f32.mrf.mxu2  ;;  %v672_v17 = vpop.f32.mrf.mxu0 }
  0xb1   : > { %v686_v18 = vpop.f32.mrf.mxu1  ;;  %v712_v19 = vpop.f32.mrf.mxu3  ;;  %v699_v21 = vadd.f32 %v698_v14, %v685_v16  ;;  %v673_v22 = vadd.f32 %v1152_v12, %v672_v17 }
  0xb3   : > { %v713_v23 = vadd.f32 %v712_v19, %v699_v21  ;;  %v687_v24 = vadd.f32 %v686_v18, %v673_v22 }
  0xb8   : > { %v700_v20 = vpop.f32.mrf.mxu2 }
  0xb9   : > { %v701_v29 = vadd.f32 %v700_v20, %v687_v24  ;;  %v714_v31 = vpop.f32.mrf.mxu3 }
  0xbb   : > { %v715_v33 = vadd.f32 %v714_v31, %v701_v29 }
  0xc8   : > { %v726_v25 = vpop.f32.mrf.mxu0  ;;  %v754_v28 = vpop.f32.mrf.mxu2 }
  0xc9   : > { %v727_v26 = vadd.f32 %v726_v25, %v713_v23  ;;  %v740_v27 = vpop.f32.mrf.mxu1 }
  0xcb   : > { %v741_v30 = vadd.f32 %v740_v27, %v727_v26 }
  0xcd   : > { %v755_v32 = vadd.f32 %v754_v28, %v741_v30 }
  0xcf   : > { %vm759_vm1 = vcmp.ge.f32.partialorder %v755_v32, 0.0  ;;  %v761_v34 = vmul.f32 0.25, %v755_v32 }
  0xd0   : > { %v728_v35 = vpop.f32.mrf.mxu0  ;;  %v756_v41 = vpop.f32.mrf.mxu2 }
  0xd1   : > { %v763_v36 = vsel %vm759_vm1, %v755_v32, %v761_v34  ;;  %v729_v37 = vadd.f32 %v728_v35, %v715_v33  ;;  %v742_v39 = vpop.f32.mrf.mxu1 }
  0xd2   : > { %v765_v38 = vpack.c.bf16 %v763_v36, %v763_v36 }
  0xd3   : > { %v743_v40 = vadd.f32 %v742_v39, %v729_v37 }
  0xd4   : > { %768 = vst.msk [vmem:[%s175_s5] sm:$0xf] %vm767_vm2, %v765_v38 }
  0xd5   : > { %v757_v42 = vadd.f32 %v756_v41, %v743_v40 }
  0xd7   : > { %vm760_vm3 = vcmp.ge.f32.partialorder %v757_v42, 0.0  ;;  %v762_v43 = vmul.f32 0.25, %v757_v42 }
  0xd9   : > { %v764_v44 = vsel %vm760_vm3, %v757_v42, %v762_v43 }
  0xda   : > { %v766_v45 = vpack.c.bf16 %v764_v44, %v764_v44 }
  0xdc   : > { %769 = vst.msk [vmem:[%s175_s5 + $0x4] sm:$0xf] %vm767_vm2, %v766_v45 }
  0xdd PF: > { %s13_s12 = sadd.s32 1, %s1159_s12  }
  0xde   : > { %p10_p4 = scmp.ge.s32.totalorder %s13_s12, 4  }
  0xe0   :  { %12 = sbr.rel (!%p10_p4) target bundleno = 1 (0x1), region = 62 }

// kernel: one_scale_multistep_predictor_forward.8
= control target key start
LH: loop header
LB: loop body
LE: loop exit
PB: predicated region body
PF: predicated region fallthrough
CT: control target
= control target key end

     0   :  { %s1335_s18 = smov 0   ;;  %s1564_s0 = inlined_call_operand.vmem [shape: bf16[32,864], index: 0, kind: input, shape index: {}]   ;;  %s1565_s1 = inlined_call_operand.vmem [shape: bf16[864,32], index: 1, kind: input, shape index: {}]   ;;  %s1566_s2 = inlined_call_operand.vmem [shape: f32[1,32], index: 2, kind: input, shape index: {}]   ;;  %s1567_s3 = inlined_call_operand.vmem [shape: bf16[32,256], index: 3, kind: input, shape index: {}]   ;;  %s1568_s4 = inlined_call_operand.vmem [shape: f32[1,256], index: 4, kind: input, shape index: {}]   ;;  %s1569_s5 = inlined_call_operand.vmem [shape: bf16[32,256], index: 5, kind: output, shape index: {}]  }
   0x1 LB: > { %s946_s19 = sadd.s32 4294967295, %s1303_s18   ;;  %p950_p0 = scmp.ge.s32.totalorder %s1303_s18, 1  ;;  %s1303_s18 = sphi %s1335_s18, %s15_s18  }
   0x2   : > { %p189_p1 = scmp.lt.s32.totalorder %s1303_s18, 3 }
   0x4   : > { %p190_p2 = pnand %p950_p0, %p189_p1 }
   0x5   : > { %s951_s21 = sshll.u32 (!%p190_p2), %s946_s19, 1 }
   0x6   : > { %193 = sbr.rel (%p190_p2) target bundleno = 381 (0x17d), region = 40  ;;  %p220_p3 = scmp.lt.s32.totalorder (!%p190_p2), %s951_s21, 3 }
   0xb   : > { %v1236_v0 = vld [vmem:[%s1565_s1 + $0x38] sm:$0xff]  ;;  %v1235_v3 = vld [vmem:[%s1565_s1 + $0x30] sm:$0xff]  ;;  %v1234_v8 = vld [vmem:[%s1565_s1 + $0x28] sm:$0xff]  ;;  %s1571_s21 = smov (!%p220_p3, %s951_s21), 3  ;;  %vm713_vm0 = vcmask 785408   ;;  %vm852_vm3 = vcmask 261120  }
   0xc   : > { %v1244_v1 = vld [vmem:[%s1565_s1 + $0x78] sm:$0xff]  ;;  %717 = vmatpush.bf16.msra.mxu0 %v1236_v0  ;;  %v1243_v4 = vld [vmem:[%s1565_s1 + $0x70] sm:$0xff]  ;;  %v1242_v9 = vld [vmem:[%s1565_s1 + $0x68] sm:$0xff]  ;;  %s1287_s20 = smul.u32 28, %s1571_s21  ;;  %s1221_s14 = sshll.u32 %s1571_s21, 3 }
   0xd   : > { %v1252_v2 = vld [vmem:[%s1565_s1 + $0xb8] sm:$0xff]  ;;  %731 = vmatpush.bf16.msra.mxu1 %v1244_v1  ;;  %v1251_v6 = vld [vmem:[%s1565_s1 + $0xb0] sm:$0xff]  ;;  %v1250_v10 = vld [vmem:[%s1565_s1 + $0xa8] sm:$0xff]  ;;  %s231_s17 = scalar_lea.vmem %s1569_s5, %s1221_s14 }
   0xe   : > { %v1260_v5 = vld [vmem:[%s1565_s1 + $0xf8] sm:$0xff]  ;;  %745 = vmatpush.bf16.msra.mxu2 %v1252_v2  ;;  %v1259_v7 = vld [vmem:[%s1565_s1 + $0xf0] sm:$0xff]  ;;  %v1258_v11 = vld [vmem:[%s1565_s1 + $0xe8] sm:$0xff]  ;;  %s1430_s6 = scalar_lea.vmem %s1564_s0, %s1287_s20 }
   0xf   : > { %759 = vmatpush.bf16.msra.mxu3 %v1260_v5  ;;  %v1233_v12 = vld [vmem:[%s1565_s1 + $0x20] sm:$0xff]  ;;  %v1232_v16 = vld [vmem:[%s1565_s1 + $0x18] sm:$0xff]  ;;  %v1231_v20 = vld [vmem:[%s1565_s1 + $0x10] sm:$0xff] }
  0x10   : > { %718 = vmatpush.bf16.msra.mxu0 %v1235_v3  ;;  %v1241_v13 = vld [vmem:[%s1565_s1 + $0x60] sm:$0xff]  ;;  %v1240_v17 = vld [vmem:[%s1565_s1 + $0x58] sm:$0xff]  ;;  %v1239_v21 = vld [vmem:[%s1565_s1 + $0x50] sm:$0xff] }
  0x11   : > { %732 = vmatpush.bf16.msra.mxu1 %v1243_v4  ;;  %v1249_v14 = vld [vmem:[%s1565_s1 + $0xa0] sm:$0xff]  ;;  %v1248_v18 = vld [vmem:[%s1565_s1 + $0x98] sm:$0xff]  ;;  %v1247_v22 = vld [vmem:[%s1565_s1 + $0x90] sm:$0xff] }
  0x12   : > { %746 = vmatpush.bf16.msra.mxu2 %v1251_v6  ;;  %v1257_v15 = vld [vmem:[%s1565_s1 + $0xe0] sm:$0xff]  ;;  %v1256_v19 = vld [vmem:[%s1565_s1 + $0xd8] sm:$0xff]  ;;  %v1255_v23 = vld [vmem:[%s1565_s1 + $0xd0] sm:$0xff] }
  0x13   : > { %760 = vmatpush.bf16.msra.mxu3 %v1259_v7  ;;  %v1230_v24 = vld [vmem:[%s1565_s1 + $0x8] sm:$0xff]  ;;  %v1229_v27 = vld [vmem:[%s1565_s1] sm:$0xff]  ;;  %v1268_v31 = vld [vmem:[%s1565_s1 + $0x138] sm:$0xff] }
  0x14   : > { %719 = vmatpush.bf16.msra.mxu0 %v1234_v8  ;;  %v1238_v25 = vld [vmem:[%s1565_s1 + $0x48] sm:$0xff]  ;;  %v1237_v29 = vld [vmem:[%s1565_s1 + $0x40] sm:$0xff]  ;;  %v1225_v34 = vld [vmem:[%s1430_s6 + $0x18] sm:$0xf0] }
  0x15   : > { %733 = vmatpush.bf16.msra.mxu1 %v1242_v9  ;;  %v1246_v26 = vld [vmem:[%s1565_s1 + $0x88] sm:$0xff]  ;;  %v1245_v30 = vld [vmem:[%s1565_s1 + $0x80] sm:$0xff]  ;;  %v1276_v38 = vld [vmem:[%s1565_s1 + $0x178] sm:$0xff] }
  0x16   : > { %747 = vmatpush.bf16.msra.mxu2 %v1250_v10  ;;  %v1254_v28 = vld [vmem:[%s1565_s1 + $0xc8] sm:$0xff]  ;;  %v958_v33 = vld [vmem:[%s1430_s6] sm:$0xf]  ;;  %v1226_v35 = vld [vmem:[%s1430_s6 + $0x20] sm:$0xf0] }
  0x17   : > { %761 = vmatpush.bf16.msra.mxu3 %v1258_v11  ;;  %v966_v32 = vld [vmem:[%s1430_s6 + $0x8] sm:$0xf]  ;;  %v1222_v36 = vld [vmem:[%s1430_s6 + $0x4] sm:$0xf]  ;;  %v960_v37 = vld [vmem:[%s1430_s6 + $0x1c] sm:$0xf0]  ;;  %v959_v41 = vor.u32 %v1225_v34, %v958_v33 }
  0x18   : > { %720 = vmatpush.bf16.msra.mxu0 %v1233_v12  ;;  %v1282_v39 = vld [vmem:[%s1565_s1 + $0x1a8] sm:$0xff]  ;;  %v1253_v40 = vld [vmem:[%s1565_s1 + $0xc0] sm:$0xff]  ;;  %v967_v42 = vor.u32 %v1226_v35, %v966_v32  ;;  %v963_v45 = vor.u32 %v1222_v36, %v960_v37  ;;  %v1267_v46 = vld [vmem:[%s1565_s1 + $0x130] sm:$0xff] }
  0x19   : > { %734 = vmatpush.bf16.msra.mxu1 %v1241_v13  ;;  %v1223_v43 = vld [vmem:[%s1430_s6 + $0xc] sm:$0xf]  ;;  %v968_v44 = vld [vmem:[%s1430_s6 + $0x24] sm:$0xf0]  ;;  %v1275_v47 = vld [vmem:[%s1565_s1 + $0x170] sm:$0xff] }
  0x1a   : > { %748 = vmatpush.bf16.msra.mxu2 %v1249_v14  ;;  %v1281_v48 = vld [vmem:[%s1565_s1 + $0x1a0] sm:$0xff]  ;;  %v971_v49 = vor.u32 %v1223_v43, %v968_v44  ;;  %v1266_v50 = vld [vmem:[%s1565_s1 + $0x128] sm:$0xff]  ;;  %v1280_v52 = vld [vmem:[%s1565_s1 + $0x198] sm:$0xff] }
  0x1b   : > { %762 = vmatpush.bf16.msra.mxu3 %v1257_v15  ;;  %v1274_v51 = vld [vmem:[%s1565_s1 + $0x168] sm:$0xff]  ;;  %v1265_v53 = vld [vmem:[%s1565_s1 + $0x120] sm:$0xff]  ;;  %v1279_v55 = vld [vmem:[%s1565_s1 + $0x190] sm:$0xff] }
  0x1c   : > { %721 = vmatpush.bf16.msra.mxu0 %v1232_v16  ;;  %v1273_v54 = vld [vmem:[%s1565_s1 + $0x160] sm:$0xff]  ;;  %v1264_v56 = vld [vmem:[%s1565_s1 + $0x118] sm:$0xff]  ;;  %v1278_v58 = vld [vmem:[%s1565_s1 + $0x188] sm:$0xff] }
  0x1d   : > { %735 = vmatpush.bf16.msra.mxu1 %v1240_v17  ;;  %v1272_v57 = vld [vmem:[%s1565_s1 + $0x158] sm:$0xff]  ;;  %v1263_v59 = vld [vmem:[%s1565_s1 + $0x110] sm:$0xff]  ;;  %v1277_v61 = vld [vmem:[%s1565_s1 + $0x180] sm:$0xff] }
  0x1e   : > { %749 = vmatpush.bf16.msra.mxu2 %v1248_v18  ;;  %v1271_v60 = vld [vmem:[%s1565_s1 + $0x150] sm:$0xff]  ;;  %v982_v62 = vld [vmem:[%s1430_s6 + $0x18] sm:$0xf]  ;;  %v1262_v1 = vld [vmem:[%s1565_s1 + $0x108] sm:$0xff] }
  0x1f   : > { %763 = vmatpush.bf16.msra.mxu3 %v1256_v19  ;;  %v1228_v63 = vld [vmem:[%s1430_s6 + $0x30] sm:$0xf0]  ;;  %v1270_v2 = vld [vmem:[%s1565_s1 + $0x148] sm:$0xff]  ;;  %v1261_v3 = vld [vmem:[%s1565_s1 + $0x100] sm:$0xff] }
  0x20   : > { %722 = vmatpush.bf16.msra.mxu0 %v1231_v20  ;;  %v983_v0 = vor.u32 %v1228_v63, %v982_v62  ;;  %v974_v4 = vld [vmem:[%s1430_s6 + $0x10] sm:$0xf]  ;;  %v1227_v5 = vld [vmem:[%s1430_s6 + $0x28] sm:$0xf0]  ;;  %v1269_v6 = vld [vmem:[%s1565_s1 + $0x140] sm:$0xff] }
  0x21   : > { %736 = vmatpush.bf16.msra.mxu1 %v1239_v21  ;;  %v1224_v7 = vld [vmem:[%s1430_s6 + $0x14] sm:$0xf]  ;;  %v976_v8 = vld [vmem:[%s1430_s6 + $0x2c] sm:$0xf0]  ;;  %v975_v9 = vor.u32 %v1227_v5, %v974_v4  ;;  %v1286_v12 = vld [vmem:[%s1567_s3 + $0x14] sm:$0xf0] }
  0x22   : > { %750 = vmatpush.bf16.msra.mxu2 %v1247_v22  ;;  %v979_v10 = vor.u32 %v1224_v7, %v976_v8  ;;  %v1211_v11 = vld [vmem:[%s1567_s3 + $0x10] sm:$0xf]  ;;  %v1296_v15 = vld [vmem:[%s1566_s2] ss:$0 sm:$0xff]  ;;  %v1284_v18 = vld [vmem:[%s1567_s3 + $0x4] sm:$0xf0] }
  0x23   : > { %764 = vmatpush.bf16.msra.mxu3 %v1255_v23  ;;  %v1212_v13 = vor.u32 %v1286_v12, %v1211_v11  ;;  %v1203_v17 = vld [vmem:[%s1567_s3] sm:$0xf]  ;;  %v1285_v22 = vld [vmem:[%s1567_s3 + $0x14] sm:$0xf]  ;;  %v1213_v23 = vld [vmem:[%s1567_s3 + $0x18] sm:$0xf0] }
  0x24   : > { %723 = vmatpush.bf16.msra.mxu0 %v1230_v24  ;;  %v1204_v20 = vor.u32 %v1284_v18, %v1203_v17  ;;  %v1283_v24 = vld [vmem:[%s1567_s3 + $0x4] sm:$0xf] }
  0x25   : > { %737 = vmatpush.bf16.msra.mxu1 %v1238_v25  ;;  %v1216_v25 = vor.u32 %v1285_v22, %v1213_v23 }
  0x26   : > { %751 = vmatpush.bf16.msra.mxu2 %v1246_v26  ;;  %v1205_v26 = vld [vmem:[%s1567_s3 + $0x8] sm:$0xf0] }
  0x27   : > { %765 = vmatpush.bf16.msra.mxu3 %v1254_v28  ;;  %v1208_v28 = vor.u32 %v1283_v24, %v1205_v26 }
  0x28   : > { %724 = vmatpush.bf16.msra.mxu0 %v1229_v27 }
  0x29   : > { %738 = vmatpush.bf16.msra.mxu1 %v1237_v29 }
  0x2a   : > { %752 = vmatpush.bf16.msra.mxu2 %v1245_v30 }
  0x2b   : > { %766 = vmatpush.bf16.msra.mxu3 %v1253_v40  ;;  %725 = vmatmul.bf16.vlgmr.msra.gmra.mxu0 %v959_v41 }
  0x2c   : > { %773 = vmatpush.bf16.msrb.mxu0 %v1268_v31  ;;  %739 = vmatmul.bf16.vlgmr.msra.gmra.mxu1 %v963_v45 }
  0x2d   : > { %787 = vmatpush.bf16.msrb.mxu1 %v1276_v38  ;;  %753 = vmatmul.bf16.vlgmr.msra.gmra.mxu2 %v967_v42 }
  0x2e   : > { %803 = vmatpush.bf16.msrb.mxu2 %v1282_v39  ;;  %767 = vmatmul.bf16.vlgmr.msra.gmra.mxu3 %v971_v49 }
  0x2f   : > { %862 = vmatpush.bf16.msrb.mxu3 %v1212_v13 }
  0x30   : > { %774 = vmatpush.bf16.msrb.mxu0 %v1267_v46 }
  0x31   : > { %788 = vmatpush.bf16.msrb.mxu1 %v1275_v47 }
  0x32   : > { %804 = vmatpush.bf16.msrb.mxu2 %v1281_v48 }
  0x33   : > { %863 = vmatpush.bf16.msrb.mxu3 %v1204_v20 }
  0x34   : > { %775 = vmatpush.bf16.msrb.mxu0 %v1266_v50 }
  0x35   : > { %789 = vmatpush.bf16.msrb.mxu1 %v1274_v51 }
  0x36   : > { %805 = vmatpush.bf16.msrb.mxu2 %v1280_v52 }
  0x37   : > { %876 = vmatpush.bf16.msra.mxu3 %v1216_v25 }
  0x38   : > { %776 = vmatpush.bf16.msrb.mxu0 %v1265_v53 }
  0x39   : > { %790 = vmatpush.bf16.msrb.mxu1 %v1273_v54 }
  0x3a   : > { %806 = vmatpush.bf16.msrb.mxu2 %v1279_v55 }
  0x3b   : > { %877 = vmatpush.bf16.msra.mxu3 %v1208_v28 }
  0x3c   : > { %777 = vmatpush.bf16.msrb.mxu0 %v1264_v56 }
  0x3d   : > { %791 = vmatpush.bf16.msrb.mxu1 %v1272_v57 }
  0x3e   : > { %807 = vmatpush.bf16.msrb.mxu2 %v1278_v58 }
  0x40   : > { %778 = vmatpush.bf16.msrb.mxu0 %v1263_v59  ;;  %v826_v59 = vld [vmem:[%s1568_s4] sm:$0x3] }
  0x41   : > { %792 = vmatpush.bf16.msrb.mxu1 %v1271_v60  ;;  %v828_v60 = vperm.slane %v826_v59, 0 }
  0x42   : > { %808 = vmatpush.bf16.msrb.mxu2 %v1277_v61  ;;  %v829_v61 = vperm.slane %v826_v59, 1 }
  0x44   : > { %779 = vmatpush.bf16.msrb.mxu0 %v1262_v1 }
  0x45   : > { %1200 = vmatmul.msk.bf16.vlgmr.msrb.gmra.mxu2 %vm713_vm0, %v983_v0  ;;  %793 = vmatpush.bf16.msrb.mxu1 %v1270_v2 }
  0x48   : > { %780 = vmatpush.bf16.msrb.mxu0 %v1261_v3 }
  0x49   : > { %794 = vmatpush.bf16.msrb.mxu1 %v1269_v6 }
  0x4b   : > { %781 = vmatmul.bf16.vlgmr.msrb.gmra.mxu0 %v975_v9 }
  0x4c   : > { %795 = vmatmul.bf16.vlgmr.msrb.gmra.mxu1 %v979_v10 }
  0xa8   : > { %v726_v14 = vpop.f32.mrf.mxu0 }
  0xa9   : > { %v740_v16 = vpop.f32.mrf.mxu1  ;;  %v727_v21 = vadd.f32 %v1296_v15, %v726_v14 }
  0xab   : > { %v741_v27 = vadd.f32 %v740_v16, %v727_v21 }
  0xb0   : > { %v754_v19 = vpop.f32.mrf.mxu2  ;;  %v728_v29 = vpop.f32.mrf.mxu0 }
  0xb1   : > { %v742_v30 = vpop.f32.mrf.mxu1  ;;  %v768_v31 = vpop.f32.mrf.mxu3  ;;  %v755_v33 = vadd.f32 %v754_v19, %v741_v27  ;;  %v729_v34 = vadd.f32 %v1296_v15, %v728_v29 }
  0xb3   : > { %v769_v35 = vadd.f32 %v768_v31, %v755_v33  ;;  %v743_v36 = vadd.f32 %v742_v30, %v729_v34 }
  0xb8   : > { %v756_v32 = vpop.f32.mrf.mxu2 }
  0xb9   : > { %v757_v41 = vadd.f32 %v756_v32, %v743_v36  ;;  %v770_v42 = vpop.f32.mrf.mxu3 }
  0xbb   : > { %v771_v44 = vadd.f32 %v770_v42, %v757_v41 }
  0xc8   : > { %v782_v37 = vpop.f32.mrf.mxu0  ;;  %v810_v40 = vpop.f32.mrf.mxu2 }
  0xc9   : > { %v783_v38 = vadd.f32 %v782_v37, %v769_v35  ;;  %v796_v39 = vpop.f32.mrf.mxu1 }
  0xcb   : > { %v797_v43 = vadd.f32 %v796_v39, %v783_v38 }
  0xcd   : > { %v811_v46 = vadd.f32 %v810_v40, %v797_v43 }
  0xcf   : > { %v817_v51 = vmul.f32 0.25, %v811_v46  ;;  %vm815_vm1 = vcmp.ge.f32.partialorder %v811_v46, 0.0 }
  0xd0   : > { %v784_v45 = vpop.f32.mrf.mxu0  ;;  %v812_v50 = vpop.f32.mrf.mxu2 }
  0xd1   : > { %v785_v47 = vadd.f32 %v784_v45, %v771_v44  ;;  %v798_v48 = vpop.f32.mrf.mxu1  ;;  %v819_v54 = vsel %vm815_vm1, %v811_v46, %v817_v51 }
  0xd3   : > { %v799_v49 = vadd.f32 %v798_v48, %v785_v47 }
  0xd5   : > { %v813_v52 = vadd.f32 %v812_v50, %v799_v49 }
  0xd7   : > { %vm816_vm2 = vcmp.ge.f32.partialorder %v813_v52, 0.0  ;;  %v818_v53 = vmul.f32 0.25, %v813_v52 }
  0xd9   : > { %v820_v55 = vsel %vm816_vm2, %v813_v52, %v818_v53 }
  0xda   : > { %v821_v56 = vpack.c.bf16 %v820_v55, %v819_v54 }
  0xdc   : > { %1217 = vmatmul.msk.bf16.vlgmr.msrb.gmra.mxu3 %vm852_vm3, %v821_v56 }
  0xec   : > { %1218 = vmatmul.msk.bf16.vlgmr.msra.gmra.mxu3 %vm852_vm3, %v821_v56 }
 0x15f   : > { %v865_v57 = vpop.f32.mrf.mxu3 }
 0x160   : > { %v866_v63 = vadd.f32 %v865_v57, %v828_v60 }
 0x167   : > { %v867_v58 = vpop.f32.mrf.mxu3 }
 0x168   : > { %v868_v3 = vadd.f32 %v867_v58, %v828_v60 }
 0x16f   : > { %v879_v62 = vpop.f32.mrf.mxu3 }
 0x170   : > { %v880_v0 = vadd.f32 %v879_v62, %v829_v61 }
 0x172   : > { %v884_v1 = vpack.c.bf16 %v880_v0, %v866_v63 }
 0x174   : > { %886 = vst [vmem:[%s231_s17] sm:$0xff] %v884_v1 }
 0x177   : > { %v881_v2 = vpop.f32.mrf.mxu3 }
 0x178   : > { %v882_v4 = vadd.f32 %v881_v2, %v829_v61 }
 0x17a   : > { %v885_v5 = vpack.c.bf16 %v882_v4, %v868_v3 }
 0x17c   : > { %887 = vst [vmem:[%s231_s17 + $0x8] sm:$0xff] %v885_v5 }
 0x17d PF: > { %s15_s18 = sadd.s32 1, %s1303_s18  }
 0x17e   : > { %p12_p4 = scmp.ge.s32.totalorder %s15_s18, 4  }
 0x180   :  { %14 = sbr.rel (!%p12_p4) target bundleno = 1 (0x1), region = 70 }

// kernel: one_scale_multistep_predictor_forward.9
= control target key start
LH: loop header
LB: loop body
LE: loop exit
PB: predicated region body
PF: predicated region fallthrough
CT: control target
= control target key end

     0   :  { %s1943_s21 = smov 0   ;;  %s2404_s0 = inlined_call_operand.vmem [shape: bf16[96,864], index: 0, kind: input, shape index: {}]   ;;  %s2405_s1 = inlined_call_operand.vmem [shape: s32[96,1], index: 1, kind: input, shape index: {}]   ;;  %s2406_s2 = inlined_call_operand.vmem [shape: bf16[864,32], index: 2, kind: input, shape index: {}]   ;;  %s2407_s3 = inlined_call_operand.vmem [shape: f32[1,32], index: 3, kind: input, shape index: {}]   ;;  %s2408_s4 = inlined_call_operand.vmem [shape: bf16[32,256], index: 4, kind: input, shape index: {}]   ;;  %s2409_s5 = inlined_call_operand.vmem [shape: f32[1,256], index: 5, kind: input, shape index: {}]   ;;  %s2410_s6 = inlined_call_operand.vmem [shape: f32[2,8,128], index: 6, kind: output, shape index: {}]  }
   0x1 LB: > { %s1949_s22 = sadd.s32 4294967295, %s1904_s21   ;;  %p1411_p0 = scmp.ge.s32.totalorder %s1904_s21, 1  ;;  %s1904_s21 = sphi %s1943_s21, %s16_s21  }
   0x2   : > { %p225_p1 = scmp.lt.s32.totalorder %s1904_s21, 3 }
   0x4   : > { %p226_p2 = pnand %p1411_p0, %p225_p1 }
   0x5   : > { %s260_s15 = smul.u32 (!%p226_p2), 6, %s1949_s22  ;;  %p273_p4 = scmp.lt.s32.totalorder (!%p226_p2), %s1949_s22, 1 }
   0x6   : > { %229 = sbr.rel (%p226_p2) target bundleno = 891 (0x37b), region = 44 }
   0x7   : > { %p261_p3 = scmp.lt.s32.totalorder (!%p226_p2), %s260_s15, 11 }
   0xb   : > { %v1776_v0 = vld [vmem:[%s2406_s2 + $0x38] sm:$0xff]  ;;  %v1775_v2 = vld [vmem:[%s2406_s2 + $0x30] sm:$0xff]  ;;  %v1774_v6 = vld [vmem:[%s2406_s2 + $0x28] sm:$0xff]  ;;  %s2412_s15 = smov (!%p261_p3, %s260_s15), 11  ;;  %vm843_vm0 = vcmask 785408   ;;  %vm1072_vm3 = vcmask 261120  }
   0xc   : > { %v1792_v1 = vld [vmem:[%s2406_s2 + $0xb8] sm:$0xff]  ;;  %1827 = vmatpush.bf16.msra.mxu1 %v1776_v0  ;;  %v1791_v3 = vld [vmem:[%s2406_s2 + $0xb0] sm:$0xff]  ;;  %853 = vmatpush.bf16.msra.mxu0 %v1776_v0  ;;  %v1790_v7 = vld [vmem:[%s2406_s2 + $0xa8] sm:$0xff]  ;;  %s1845_s12 = smul.u32 28, %s2412_s15  ;;  %s1413_s30 = sshll.u32 %s2412_s15, 3 }
   0xd   : > { %901 = vmatpush.bf16.msra.mxu2 %v1792_v1  ;;  %v1800_v4 = vld [vmem:[%s2406_s2 + $0xf8] sm:$0xff]  ;;  %v1799_v5 = vld [vmem:[%s2406_s2 + $0xf0] sm:$0xff]  ;;  %v1798_v8 = vld [vmem:[%s2406_s2 + $0xe8] sm:$0xff]  ;;  %s2230_s9 = scalar_lea.vmem %s2405_s1, %s1413_s30  ;;  %s2414_s22 = smov (!%p273_p4, %s1949_s22), 1 }
   0xe   : > { %925 = vmatpush.bf16.msra.mxu3 %v1800_v4  ;;  %v1773_v9 = vld [vmem:[%s2406_s2 + $0x20] sm:$0xff]  ;;  %v1772_v12 = vld [vmem:[%s2406_s2 + $0x18] sm:$0xff]  ;;  %v1771_v15 = vld [vmem:[%s2406_s2 + $0x10] sm:$0xff]  ;;  %s2020_s24 = scalar_lea.vmem %s2404_s0, %s1845_s12  ;;  %s1414_s10 = sshll.u32 %s2414_s22, 3 }
   0xf   : > { %v1789_v10 = vld [vmem:[%s2406_s2 + $0xa0] sm:$0xff]  ;;  %v1788_v13 = vld [vmem:[%s2406_s2 + $0x98] sm:$0xff]  ;;  %v1787_v16 = vld [vmem:[%s2406_s2 + $0x90] sm:$0xff]  ;;  %s276_s13 = scalar_lea.vmem %s2410_s6, %s1414_s10 }
  0x10   : > { %1828 = vmatpush.bf16.msra.mxu1 %v1775_v2  ;;  %854 = vmatpush.bf16.msra.mxu0 %v1775_v2  ;;  %v1797_v11 = vld [vmem:[%s2406_s2 + $0xe0] sm:$0xff]  ;;  %v1796_v14 = vld [vmem:[%s2406_s2 + $0xd8] sm:$0xff]  ;;  %v1795_v17 = vld [vmem:[%s2406_s2 + $0xd0] sm:$0xff] }
  0x11   : > { %902 = vmatpush.bf16.msra.mxu2 %v1791_v3  ;;  %v1770_v18 = vld [vmem:[%s2406_s2 + $0x8] sm:$0xff]  ;;  %v1769_v20 = vld [vmem:[%s2406_s2] sm:$0xff]  ;;  %v1784_v23 = vld [vmem:[%s2406_s2 + $0x78] sm:$0xff] }
  0x12   : > { %926 = vmatpush.bf16.msra.mxu3 %v1799_v5  ;;  %v1786_v19 = vld [vmem:[%s2406_s2 + $0x88] sm:$0xff]  ;;  %v1785_v22 = vld [vmem:[%s2406_s2 + $0x80] sm:$0xff]  ;;  %v1473_v26 = vld [vmem:[%s2020_s24 + $0x70] sm:$0xf] }
  0x13   : > { %v1794_v21 = vld [vmem:[%s2406_s2 + $0xc8] sm:$0xff]  ;;  %v1752_v25 = vld [vmem:[%s2020_s24 + $0x20] sm:$0xf0]  ;;  %v1417_v28 = vld [vmem:[%s2020_s24] sm:$0xf] }
  0x14   : > { %1829 = vmatpush.bf16.msra.mxu1 %v1774_v6  ;;  %855 = vmatpush.bf16.msra.mxu0 %v1774_v6  ;;  %v1425_v24 = vld [vmem:[%s2020_s24 + $0x8] sm:$0xf]  ;;  %v1765_v27 = vld [vmem:[%s2020_s24 + $0x88] sm:$0xf0]  ;;  %v1751_v29 = vld [vmem:[%s2020_s24 + $0x18] sm:$0xf0] }
  0x15   : > { %903 = vmatpush.bf16.msra.mxu2 %v1790_v7  ;;  %v1808_v30 = vld [vmem:[%s2406_s2 + $0x138] sm:$0xff]  ;;  %v1793_v31 = vld [vmem:[%s2406_s2 + $0xc0] sm:$0xff]  ;;  %v1749_v32 = vld [vmem:[%s2020_s24 + $0xc] sm:$0xf]  ;;  %v1426_v34 = vor.u32 %v1752_v25, %v1425_v24  ;;  %v1474_v35 = vor.u32 %v1765_v27, %v1473_v26  ;;  %v1418_v36 = vor.u32 %v1751_v29, %v1417_v28 }
  0x16   : > { %927 = vmatpush.bf16.msra.mxu3 %v1798_v8  ;;  %v1427_v33 = vld [vmem:[%s2020_s24 + $0x24] sm:$0xf0]  ;;  %v1783_v38 = vld [vmem:[%s2406_s2 + $0x70] sm:$0xff]  ;;  %v2060_v41 = vld [vmem:[%s2406_s2 + $0x178] sm:$0xff] }
  0x17   : > { %v1822_v37 = vld [vmem:[%s2406_s2 + $0x1a8] sm:$0xff]  ;;  %v1430_v39 = vor.u32 %v1749_v32, %v1427_v33  ;;  %v1807_v40 = vld [vmem:[%s2406_s2 + $0x130] sm:$0xff]  ;;  %v1821_v42 = vld [vmem:[%s2406_s2 + $0x1a0] sm:$0xff] }
  0x18   : > { %1830 = vmatpush.bf16.msra.mxu1 %v1773_v9  ;;  %856 = vmatpush.bf16.msra.mxu0 %v1773_v9  ;;  %v1782_v43 = vld [vmem:[%s2406_s2 + $0x68] sm:$0xff]  ;;  %v2075_v45 = vld [vmem:[%s2406_s2 + $0x170] sm:$0xff]  ;;  %v1820_v46 = vld [vmem:[%s2406_s2 + $0x198] sm:$0xff] }
  0x19   : > { %904 = vmatpush.bf16.msra.mxu2 %v1789_v10  ;;  %v1806_v44 = vld [vmem:[%s2406_s2 + $0x128] sm:$0xff]  ;;  %v1781_v47 = vld [vmem:[%s2406_s2 + $0x60] sm:$0xff]  ;;  %v1780_v50 = vld [vmem:[%s2406_s2 + $0x58] sm:$0xff] }
  0x1a   : > { %928 = vmatpush.bf16.msra.mxu3 %v1797_v11  ;;  %v1805_v48 = vld [vmem:[%s2406_s2 + $0x120] sm:$0xff]  ;;  %v2090_v49 = vld [vmem:[%s2406_s2 + $0x168] sm:$0xff]  ;;  %v1759_v52 = vld [vmem:[%s2020_s24 + $0x58] sm:$0xf0] }
  0x1b   : > { %v1453_v51 = vld [vmem:[%s2020_s24 + $0x40] sm:$0xf]  ;;  %v1819_v53 = vld [vmem:[%s2406_s2 + $0x190] sm:$0xff]  ;;  %v1445_v54 = vld [vmem:[%s2020_s24 + $0x38] sm:$0xf] }
  0x1c   : > { %1831 = vmatpush.bf16.msra.mxu1 %v1772_v12  ;;  %857 = vmatpush.bf16.msra.mxu0 %v1772_v12  ;;  %v1758_v55 = vld [vmem:[%s2020_s24 + $0x50] sm:$0xf0]  ;;  %v1804_v56 = vld [vmem:[%s2406_s2 + $0x118] sm:$0xff]  ;;  %v1756_v57 = vld [vmem:[%s2020_s24 + $0x44] sm:$0xf]  ;;  %v1454_v60 = vor.u32 %v1759_v52, %v1453_v51 }
  0x1d   : > { %905 = vmatpush.bf16.msra.mxu2 %v1788_v13  ;;  %v1455_v58 = vld [vmem:[%s2020_s24 + $0x5c] sm:$0xf0]  ;;  %v1446_v61 = vor.u32 %v1758_v55, %v1445_v54  ;;  %v1818_v62 = vld [vmem:[%s2406_s2 + $0x188] sm:$0xff]  ;;  %v1779_v63 = vld [vmem:[%s2406_s2 + $0x50] sm:$0xff] }
  0x1e   : > { %929 = vmatpush.bf16.msra.mxu3 %v1796_v14  ;;  %v1813_v59 = vld [vmem:[%s2406_s2 + $0x160] sm:$0xff]  ;;  %v1458_v0 = vor.u32 %v1756_v57, %v1455_v58  ;;  %v1803_v1 = vld [vmem:[%s2406_s2 + $0x110] sm:$0xff]  ;;  %v1812_v2 = vld [vmem:[%s2406_s2 + $0x158] sm:$0xff] }
  0x1f   : > { %v1817_v3 = vld [vmem:[%s2406_s2 + $0x180] sm:$0xff]  ;;  %v1778_v4 = vld [vmem:[%s2406_s2 + $0x48] sm:$0xff]  ;;  %v1811_v6 = vld [vmem:[%s2406_s2 + $0x150] sm:$0xff] }
  0x20   : > { %1832 = vmatpush.bf16.msra.mxu1 %v1771_v15  ;;  %858 = vmatpush.bf16.msra.mxu0 %v1771_v15  ;;  %v1802_v5 = vld [vmem:[%s2406_s2 + $0x108] sm:$0xff]  ;;  %v1777_v7 = vld [vmem:[%s2406_s2 + $0x40] sm:$0xff]  ;;  %v1481_v13 = vld [vmem:[%s2020_s24 + $0x78] sm:$0xf] }
  0x21   : > { %906 = vmatpush.bf16.msra.mxu2 %v1787_v16  ;;  %v1748_v8 = vld [vmem:[%s2020_s24 + $0x4] sm:$0xf]  ;;  %v1419_v9 = vld [vmem:[%s2020_s24 + $0x1c] sm:$0xf0]  ;;  %v1810_v11 = vld [vmem:[%s2406_s2 + $0x148] sm:$0xff] }
  0x22   : > { %930 = vmatpush.bf16.msra.mxu3 %v1795_v17  ;;  %v1801_v10 = vld [vmem:[%s2406_s2 + $0x100] sm:$0xff]  ;;  %v1422_v12 = vor.u32 %v1748_v8, %v1419_v9  ;;  %v1766_v14 = vld [vmem:[%s2020_s24 + $0x90] sm:$0xf0]  ;;  %v1433_v15 = vld [vmem:[%s2020_s24 + $0x10] sm:$0xf] }
  0x23   : > { %v1753_v16 = vld [vmem:[%s2020_s24 + $0x28] sm:$0xf0]  ;;  %v1763_v17 = vld [vmem:[%s2020_s24 + $0x7c] sm:$0xf]  ;;  %v1447_v24 = vld [vmem:[%s2020_s24 + $0x54] sm:$0xf0] }
  0x24   : > { %1833 = vmatpush.bf16.msra.mxu1 %v1770_v18  ;;  %859 = vmatpush.bf16.msra.mxu0 %v1770_v18  ;;  %v1483_v18 = vld [vmem:[%s2020_s24 + $0x94] sm:$0xf0]  ;;  %v1754_v27 = vld [vmem:[%s2020_s24 + $0x30] sm:$0xf0]  ;;  %v1461_v28 = vld [vmem:[%s2020_s24 + $0x48] sm:$0xf] }
  0x25   : > { %907 = vmatpush.bf16.msra.mxu2 %v1786_v19  ;;  %v1482_v19 = vor.u32 %v1766_v14, %v1481_v13  ;;  %v1441_v26 = vld [vmem:[%s2020_s24 + $0x18] sm:$0xf]  ;;  %v1760_v29 = vld [vmem:[%s2020_s24 + $0x60] sm:$0xf0]  ;;  %v1463_v51 = vld [vmem:[%s2020_s24 + $0x64] sm:$0xf0] }
  0x26   : > { %931 = vmatpush.bf16.msra.mxu3 %v1794_v21  ;;  %v1434_v21 = vor.u32 %v1753_v16, %v1433_v15  ;;  %v1442_v32 = vor.u32 %v1754_v27, %v1441_v26  ;;  %v1462_v33 = vor.u32 %v1760_v29, %v1461_v28  ;;  %v1728_v13 = vld [vmem:[%s2408_s4 + $0x10] sm:$0xf]  ;;  %v1826_v14 = vld [vmem:[%s2408_s4 + $0x14] sm:$0xf0] }
  0x27   : > { %v1729_v16 = vor.u32 %v1826_v14, %v1728_v13 }
  0x28   : > { %1834 = vmatpush.bf16.msra.mxu1 %v1769_v20  ;;  %860 = vmatpush.bf16.msra.mxu0 %v1769_v20  ;;  %v1809_v20 = vld [vmem:[%s2406_s2 + $0x140] sm:$0xff] }
  0x29   : > { %908 = vmatpush.bf16.msra.mxu2 %v1785_v22  ;;  %v1486_v22 = vor.u32 %v1763_v17, %v1483_v18 }
  0x2a   : > { %932 = vmatpush.bf16.msra.mxu3 %v1793_v31  ;;  %v1491_v31 = vld [vmem:[%s2020_s24 + $0x9c] sm:$0xf0] }
  0x2b   : > { %871 = vmatmul.bf16.vlgmr.msra.gmra.mxu1 %v1474_v35  ;;  %861 = vmatmul.bf16.vlgmr.msra.gmra.mxu0 %v1418_v36  ;;  %v1762_v35 = vld [vmem:[%s2020_s24 + $0x74] sm:$0xf]  ;;  %v1475_v36 = vld [vmem:[%s2020_s24 + $0x8c] sm:$0xf0] }
  0x2c   : > { %877 = vmatpush.bf16.msrb.mxu1 %v1784_v23  ;;  %949 = vmatpush.bf16.msrb.mxu0 %v1808_v30  ;;  %v1755_v23 = vld [vmem:[%s2020_s24 + $0x3c] sm:$0xf]  ;;  %v1764_v30 = vld [vmem:[%s2020_s24 + $0x84] sm:$0xf] }
  0x2d   : > { %909 = vmatmul.bf16.vlgmr.msra.gmra.mxu2 %v1426_v34  ;;  %933 = vmatmul.bf16.vlgmr.msra.gmra.mxu3 %v1430_v39  ;;  %v1450_v25 = vor.u32 %v1755_v23, %v1447_v24  ;;  %v1494_v34 = vor.u32 %v1764_v30, %v1491_v31  ;;  %v1761_v39 = vld [vmem:[%s2020_s24 + $0x68] sm:$0xf0] }
  0x2e   : > { %999 = vmatpush.bf16.msrb.mxu2 %v1822_v37  ;;  %1835 = vmatpush.bf16.msrb.mxu3 %v2060_v41  ;;  %v1478_v37 = vor.u32 %v1762_v35, %v1475_v36  ;;  %v1722_v23 = vld [vmem:[%s2408_s4 + $0x8] sm:$0xf0] }
  0x30   : > { %878 = vmatpush.bf16.msrb.mxu1 %v1783_v38  ;;  %950 = vmatpush.bf16.msrb.mxu0 %v1807_v40  ;;  %v1469_v38 = vld [vmem:[%s2020_s24 + $0x50] sm:$0xf]  ;;  %v1489_v40 = vld [vmem:[%s2020_s24 + $0x80] sm:$0xf] }
  0x32   : > { %1000 = vmatpush.bf16.msrb.mxu2 %v1821_v42  ;;  %1836 = vmatpush.bf16.msrb.mxu3 %v2075_v45  ;;  %v1470_v42 = vor.u32 %v1761_v39, %v1469_v38 }
  0x34   : > { %879 = vmatpush.bf16.msrb.mxu1 %v1782_v43  ;;  %951 = vmatpush.bf16.msrb.mxu0 %v1806_v44  ;;  %v1750_v44 = vld [vmem:[%s2020_s24 + $0x14] sm:$0xf] }
  0x36   : > { %1001 = vmatpush.bf16.msrb.mxu2 %v1820_v46  ;;  %1837 = vmatpush.bf16.msrb.mxu3 %v2090_v49 }
  0x38   : > { %880 = vmatpush.bf16.msrb.mxu1 %v1781_v47  ;;  %952 = vmatpush.bf16.msrb.mxu0 %v1805_v48  ;;  %v1497_v47 = vld [vmem:[%s2020_s24 + $0x88] sm:$0xf]  ;;  %v1768_v48 = vld [vmem:[%s2020_s24 + $0xa0] sm:$0xf0] }
  0x3a   : > { %1002 = vmatpush.bf16.msrb.mxu2 %v1819_v53  ;;  %1838 = vmatpush.bf16.msrb.mxu3 %v1813_v59 }
  0x3b   : > { %866 = vmatmul.bf16.gmra.mxu0 %v1446_v61 }
  0x3c   : > { %881 = vmatpush.bf16.msrb.mxu1 %v1780_v50  ;;  %953 = vmatpush.bf16.msrb.mxu0 %v1804_v56  ;;  %v1757_v50 = vld [vmem:[%s2020_s24 + $0x4c] sm:$0xf] }
  0x3d   : > { %914 = vmatmul.bf16.gmra.mxu2 %v1454_v60  ;;  %938 = vmatmul.bf16.gmra.mxu3 %v1458_v0  ;;  %v1466_v52 = vor.u32 %v1757_v50, %v1463_v51  ;;  %v2235_v50 = vld [vmem:[%s2230_s9 + $0x8] sm:$0xff] }
  0x3e   : > { %1003 = vmatpush.bf16.msrb.mxu2 %v1818_v62  ;;  %1839 = vmatpush.bf16.msrb.mxu3 %v1812_v2 }
  0x40   : > { %882 = vmatpush.bf16.msrb.mxu1 %v1779_v63  ;;  %954 = vmatpush.bf16.msrb.mxu0 %v1803_v1 }
  0x42   : > { %1004 = vmatpush.bf16.msrb.mxu2 %v1817_v3  ;;  %1840 = vmatpush.bf16.msrb.mxu3 %v1811_v6  ;;  %v1730_v3 = vld [vmem:[%s2408_s4 + $0x18] sm:$0xf0] }
  0x44   : > { %883 = vmatpush.bf16.msrb.mxu1 %v1778_v4  ;;  %955 = vmatpush.bf16.msrb.mxu0 %v1802_v5 }
  0x46   : > { %1841 = vmatpush.bf16.msrb.mxu3 %v1810_v11 }
  0x48   : > { %884 = vmatpush.bf16.msrb.mxu1 %v1777_v7  ;;  %956 = vmatpush.bf16.msrb.mxu0 %v1801_v10 }
  0x4a   : > { %1842 = vmatpush.bf16.msrb.mxu3 %v1809_v20 }
  0x4b   : > { %885 = vmatmul.bf16.vlgmr.msrb.gmra.mxu1 %v1422_v12  ;;  %957 = vmatmul.bf16.vlgmr.msrb.gmra.mxu0 %v1434_v21  ;;  %v1823_v21 = vld [vmem:[%s2408_s4 + $0x4] sm:$0xf] }
  0x4c   : > { %973 = vmatpush.bf16.msra.mxu1 %v2060_v41  ;;  %v1767_v41 = vld [vmem:[%s2020_s24 + $0x98] sm:$0xf0]  ;;  %v1725_v24 = vor.u32 %v1823_v21, %v1722_v23 }
  0x4d   : > { %919 = vmatmul.bf16.gmra.mxu2 %v1482_v19  ;;  %943 = vmatmul.bf16.gmra.mxu3 %v1486_v22  ;;  %v1490_v43 = vor.u32 %v1767_v41, %v1489_v40  ;;  %v1720_v19 = vld [vmem:[%s2408_s4] sm:$0xf] }
  0x4e   : > { %1088 = vmatpush.bf16.msra.mxu3 %v1729_v16 }
  0x50   : > { %974 = vmatpush.bf16.msra.mxu1 %v2075_v45  ;;  %v1435_v45 = vld [vmem:[%s2020_s24 + $0x2c] sm:$0xf0] }
  0x51   : > { %v1438_v46 = vor.u32 %v1750_v44, %v1435_v45 }
  0x54   : > { %975 = vmatpush.bf16.msra.mxu1 %v2090_v49  ;;  %v1498_v49 = vor.u32 %v1768_v48, %v1497_v47 }
  0x58   : > { %976 = vmatpush.bf16.msra.mxu1 %v1813_v59 }
  0x5b   : > { %890 = vmatmul.bf16.gmra.mxu1 %v1450_v25  ;;  %962 = vmatmul.bf16.gmra.mxu0 %v1462_v33  ;;  %v1861_v25 = vld [vmem:[%s2407_s3] ss:$0 sm:$0xff] }
  0x5c   : > { %977 = vmatpush.bf16.msra.mxu1 %v1812_v2  ;;  %v1825_v2 = vld [vmem:[%s2408_s4 + $0x14] sm:$0xf] }
  0x5d   : > { %1715 = vmatmul.msk.bf16.vlgmr.msrb.gmra.mxu2 %vm843_vm0, %v1442_v32  ;;  %991 = vmatmul.bf16.vlgmr.msrb.gmra.mxu3 %v1494_v34  ;;  %v1733_v4 = vor.u32 %v1825_v2, %v1730_v3 }
  0x5f   : > { %1112 = vmatpush.bf16.msra.mxu0 %v1733_v4  ;;  %1843 = vmatpush.bf16.msra.mxu2 %v1733_v4 }
  0x60   : > { %978 = vmatpush.bf16.msra.mxu1 %v1811_v6 }
  0x63   : > { %1113 = vmatpush.bf16.msra.mxu0 %v1725_v24  ;;  %1844 = vmatpush.bf16.msra.mxu2 %v1725_v24 }
  0x64   : > { %979 = vmatpush.bf16.msra.mxu1 %v1810_v11 }
  0x68   : > { %980 = vmatpush.bf16.msra.mxu1 %v1809_v20  ;;  %v1824_v20 = vld [vmem:[%s2408_s4 + $0x4] sm:$0xf0] }
  0x69   : > { %v1721_v22 = vor.u32 %v1824_v20, %v1720_v19 }
  0x6b   : > { %895 = vmatmul.bf16.gmra.mxu1 %v1478_v37  ;;  %967 = vmatmul.bf16.gmra.mxu0 %v1490_v43 }
  0x6c   : > { %1089 = vmatpush.bf16.msra.mxu3 %v1721_v22 }
  0x6d   : > { %1716 = vmatmul.msk.bf16.gmra.mxu2 %vm843_vm0, %v1470_v42 }
  0x7b   : > { %981 = vmatmul.bf16.vlgmr.msra.gmra.mxu1 %v1438_v46 }
  0x7d   : > { %1717 = vmatmul.msk.bf16.gmra.mxu2 %vm843_vm0, %v1498_v49 }
  0x8b   : > { %986 = vmatmul.bf16.gmra.mxu1 %v1466_v52 }
  0xa8   : > { %v862_v53 = vpop.f32.mrf.mxu0  ;;  %v872_v56 = vpop.f32.mrf.mxu1 }
  0xa9   : > { %v863_v28 = vadd.f32 %v1861_v25, %v862_v53  ;;  %v873_v37 = vadd.f32 %v1861_v25, %v872_v56 }
  0xb0   : > { %v910_v54 = vpop.f32.mrf.mxu2  ;;  %v864_v55 = vpop.f32.mrf.mxu0 }
  0xb1   : > { %v934_v59 = vpop.f32.mrf.mxu3  ;;  %v874_v60 = vpop.f32.mrf.mxu1  ;;  %v865_v32 = vadd.f32 %v1861_v25, %v864_v55 }
  0xb2   : > { %v875_v41 = vadd.f32 %v1861_v25, %v874_v60 }
  0xb8   : > { %v912_v57 = vpop.f32.mrf.mxu2  ;;  %v867_v58 = vpop.f32.mrf.mxu0 }
  0xb9   : > { %v936_v0 = vpop.f32.mrf.mxu3  ;;  %v868_v47 = vadd.f32 %v1861_v25, %v867_v58 }
  0xc0   : > { %v2181_v61 = vpop.f32.mrf.mxu2  ;;  %v2183_v62 = vpop.f32.mrf.mxu0 }
  0xc1   : > { %v2193_v8 = vpop.f32.mrf.mxu3 }
  0xc8   : > { %v886_v63 = vpop.f32.mrf.mxu1  ;;  %v2185_v1 = vpop.f32.mrf.mxu2 }
  0xc9   : > { %v958_v5 = vpop.f32.mrf.mxu0  ;;  %v2195_v12 = vpop.f32.mrf.mxu3  ;;  %v887_v30 = vadd.f32 %v886_v63, %v863_v28 }
  0xcb   : > { %v911_v34 = vadd.f32 %v910_v54, %v887_v30  ;;  %v1906_v54 = vmov 0  }
  0xcc   : > { %1859 = vset.pattern.permute.xlu1 %v1906_v54  ;;  %1860 = vset.pattern.permute.xlu2 %v1906_v54 }
  0xcd   : > { %v935_v40 = vadd.f32 %v934_v59, %v911_v34  ;;  %1233 = vperm.xlu1 %1859, %v2235_v50   ;;  %1858 = vset.pattern.permute.xlu0 %v1906_v54  ;;  %v870_v59 = vadd.f32 %v1861_v25, %v2183_v62 }
  0xcf   : > { %v959_v48 = vadd.f32 %v958_v5, %v935_v40 }
  0xd0   : > { %v888_v6 = vpop.f32.mrf.mxu1  ;;  %v920_v7 = vpop.f32.mrf.mxu2 }
  0xd1   : > { %v960_v10 = vpop.f32.mrf.mxu0  ;;  %v944_v26 = vpop.f32.mrf.mxu3  ;;  %v889_v38 = vadd.f32 %v888_v6, %v865_v32 }
  0xd3   : > { %v913_v42 = vadd.f32 %v912_v57, %v889_v38 }
  0xd5   : > { %v937_v51 = vadd.f32 %v936_v0, %v913_v42 }
  0xd7   : > { %v961_v58 = vadd.f32 %v960_v10, %v937_v51 }
  0xd8   : > { %v891_v9 = vpop.f32.mrf.mxu1  ;;  %v922_v11 = vpop.f32.mrf.mxu2 }
  0xd9   : > { %v2205_v18 = vpop.f32.mrf.mxu0  ;;  %v946_v35 = vpop.f32.mrf.mxu3  ;;  %v892_v57 = vadd.f32 %v891_v9, %v868_v47 }
  0xdb   : > { %v916_v0 = vadd.f32 %v2181_v61, %v892_v57 }
  0xdd   : > { %v940_v9 = vadd.f32 %v2193_v8, %v916_v0  ;;  %v2247_v8 = vld [vmem:[%s2230_s9 + $0x10] sm:$0xff] }
  0xde   : > { %1236 = vperm.xlu2 %1860, %v2247_v8  }
  0xdf   : > { %v964_v23 = vadd.f32 %v2205_v18, %v940_v9 }
  0xe0   : > { %v2203_v15 = vpop.f32.mrf.mxu1  ;;  %v1006_v17 = vpop.f32.mrf.mxu2 }
  0xe1   : > { %v2222_v31 = vpop.f32.mrf.mxu0  ;;  %v992_v52 = vpop.f32.mrf.mxu3 }
  0xe8   : > { %v896_v27 = vpop.f32.mrf.mxu1  ;;  %v1008_v29 = vpop.f32.mrf.mxu2 }
  0xe9   : > { %v897_v39 = vadd.f32 %v896_v27, %v873_v37  ;;  %v968_v43 = vpop.f32.mrf.mxu0  ;;  %v994_v62 = vpop.f32.mrf.mxu3 }
  0xeb   : > { %v921_v44 = vadd.f32 %v920_v7, %v897_v39  ;;  %v894_v7 = vadd.f32 %v2203_v15, %v870_v59 }
  0xed   : > { %v945_v55 = vadd.f32 %v944_v26, %v921_v44  ;;  %v918_v19 = vadd.f32 %v2185_v1, %v894_v7 }
  0xef   : > { %v969_v63 = vadd.f32 %v968_v43, %v945_v55  ;;  %v942_v1 = vadd.f32 %v2195_v12, %v918_v19  ;;  %v2310_v19 = vld [vmem:[%s2230_s9 + $0x28] sm:$0xff] }
  0xf0   : > { %v898_v33 = vpop.f32.mrf.mxu1  ;;  %v2224_v36 = vpop.f32.mrf.mxu2 }
  0xf1   : > { %v899_v45 = vadd.f32 %v898_v33, %v875_v41  ;;  %v970_v4 = vpop.f32.mrf.mxu0  ;;  %v993_v14 = vadd.f32 %v992_v52, %v969_v63  ;;  %v966_v30 = vadd.f32 %v2222_v31, %v942_v1 }
  0xf3   : > { %v923_v56 = vadd.f32 %v922_v11, %v899_v45 }
  0xf5   : > { %v947_v2 = vadd.f32 %v946_v35, %v923_v56  ;;  %v2254_v35 = vld [vmem:[%s2230_s9 + $0x18] sm:$0xff] }
  0xf6   : > { %1239 = vperm.xlu2 %1860, %v2254_v35  }
  0xf7   : > { %v971_v16 = vadd.f32 %v970_v4, %v947_v2 }
  0xf8   : > { %v982_v46 = vpop.f32.mrf.mxu1  ;;  %v2232_v49 = vpop.f32.mrf.mxu2 }
  0xf9   : > { %v983_v53 = vadd.f32 %v982_v46, %v959_v48  ;;  %v995_v21 = vadd.f32 %v994_v62, %v971_v16 }
  0xfb   : > { %v1007_v60 = vadd.f32 %v1006_v17, %v983_v53 }
  0xfd   : > { %v1027_v13 = vmul.f32 0.25, %v1007_v60  ;;  %vm1021_vm1 = vcmp.ge.f32.partialorder %v1007_v60, 0.0 }
  0xff   : > { %v1033_v61 = vsel %vm1021_vm1, %v1007_v60, %v1027_v13 }
 0x100   : > { %v984_v3 = vpop.f32.mrf.mxu1  ;;  %v1016_v6 = vpop.f32.mrf.mxu2 }
 0x101   : > { %v985_v5 = vadd.f32 %v984_v3, %v961_v58  ;;  %v1017_v17 = vadd.f32 %v1016_v6, %v993_v14 }
 0x103   : > { %v1009_v11 = vadd.f32 %v1008_v29, %v985_v5  ;;  %v1031_v25 = vmul.f32 0.25, %v1017_v17  ;;  %vm1025_vm4 = vcmp.ge.f32.partialorder %v1017_v17, 0.0  ;;  %v2290_v5 = vld [vmem:[%s2230_s9] sm:$0xff] }
 0x105   : > { %vm1022_vm2 = vcmp.ge.f32.partialorder %v1009_v11, 0.0  ;;  %v1028_v10 = vmul.f32 0.25, %v1009_v11  ;;  %v1037_v29 = vsel %vm1025_vm4, %v1017_v17, %v1031_v25  ;;  %v2306_v17 = vld [vmem:[%s2230_s9 + $0x20] sm:$0xff]  ;;  %vm1289_vm4 = vcmp.ge.s32.totalorder %v2290_v5, 0 }
 0x107   : > { %v1034_v20 = vsel %vm1022_vm2, %v1009_v11, %v1028_v10 }
 0x108   : > { %v1039_v22 = vpack.c.bf16 %v1034_v20, %v1033_v61  ;;  %v987_v15 = vpop.f32.mrf.mxu1  ;;  %v1018_v24 = vpop.f32.mrf.mxu2 }
 0x109   : > { %v1019_v26 = vadd.f32 %v1018_v24, %v995_v21  ;;  %v988_v27 = vadd.f32 %v987_v15, %v964_v23 }
 0x10a   : > { %1734 = vmatmul.msk.bf16.vlgmr.msra.gmra.mxu3 %vm1072_vm3, %v1039_v22  ;;  %1737 = vmatmul.msk.bf16.vlgmr.msra.gmra.mxu0 %vm1072_vm3, %v1039_v22 }
 0x10b   : > { %vm1026_vm5 = vcmp.ge.f32.partialorder %v1019_v26, 0.0  ;;  %v1032_v28 = vmul.f32 0.25, %v1019_v26  ;;  %v1012_v32 = vadd.f32 %v2224_v36, %v988_v27  ;;  %v1046_v36 = vld [vmem:[%s2409_s5] sm:$0x3] }
 0x10c   : > { %v1049_v43 = vperm.slane %v1046_v36, 1  ;;  %v1048_v44 = vperm.slane %v1046_v36, 0 }
 0x10d   : > { %v1038_v18 = vsel %vm1026_vm5, %v1019_v26, %v1032_v28  ;;  %v1029_v12 = vmul.f32 0.25, %v1012_v32  ;;  %vm1023_vm6 = vcmp.ge.f32.partialorder %v1012_v32, 0.0  ;;  %vm1290_vm5 = vcmp.ge.s32.totalorder %v2235_v50, 0 }
 0x10e   : > { %v1041_v33 = vpack.c.bf16 %v1038_v18, %v1037_v29 }
 0x10f   : > { %v1035_v40 = vsel %vm1023_vm6, %v1012_v32, %v1029_v12  ;;  %vm1319_vm6 = vcmask 7168  }
 0x110   : > { %v989_v34 = vpop.f32.mrf.mxu1  ;;  %1739 = vmatmul.msk.bf16.vlgmr.msra.gmra.mxu2 %vm1072_vm3, %v1041_v33 }
 0x111   : > { %v990_v37 = vadd.f32 %v989_v34, %v966_v30 }
 0x113   : > { %v1014_v38 = vadd.f32 %v2232_v49, %v990_v37 }
 0x115   : > { %vm1024_vm7 = vcmp.ge.f32.partialorder %v1014_v38, 0.0  ;;  %v1030_v39 = vmul.f32 0.25, %v1014_v38 }
 0x117   : > { %v1036_v41 = vsel %vm1024_vm7, %v1014_v38, %v1030_v39  ;;  %vm1291_vm7 = vcmp.ge.s32.totalorder %v2247_v8, 0 }
 0x118   : > { %v1040_v31 = vpack.c.bf16 %v1036_v41, %v1035_v40 }
 0x11a   : > { %1735 = vmatmul.msk.bf16.gmra.mxu3 %vm1072_vm3, %v1040_v31  ;;  %1738 = vmatmul.msk.bf16.gmra.mxu0 %vm1072_vm3, %v1040_v31 }
 0x12a   : > { %1736 = vmatmul.msk.bf16.gmra.mxu3 %vm1072_vm3, %v1041_v33 }
 0x138   : > { %v2327_v30 = vpop.permute.xlu2 %1236 }
 0x13f   : > { %v2319_v23 = vpop.permute.xlu1 %1233 }
 0x150   : > { %v1240_v41 = vpop.permute.xlu2 %1239 }
 0x187   : > { %v1115_v42 = vpop.f32.mrf.mxu0 }
 0x188   : > { %v2265_v46 = vadd.f32 %v1115_v42, %v1049_v43 }
 0x18d   : > { %v1091_v45 = vpop.f32.mrf.mxu3 }
 0x18e   : > { %v2267_v47 = vadd.f32 %v1091_v45, %v1048_v44 }
 0x18f   : > { %v1117_v48 = vpop.f32.mrf.mxu0 }
 0x190   : > { %v1139_v49 = vmax.f32 %v2267_v47, %v2265_v46  ;;  %v2271_v52 = vadd.f32 %v1117_v48, %v1049_v43 }
 0x192   : > { %1140 = vmax.xlane.f32.xlu0 %v1139_v49  ;;  %v1136_v49 = vlaneseq }
 0x193   : > { %v1125_v4 = vpop.f32.mrf.mxu2 }
 0x194   : > { %v2292_v7 = vadd.f32 %v1125_v4, %v1049_v43 }
 0x195   : > { %v1093_v51 = vpop.f32.mrf.mxu3 }
 0x196   : > { %v2273_v53 = vadd.f32 %v1093_v51, %v1048_v44 }
 0x197   : > { %v1120_v55 = vpop.f32.mrf.mxu0 }
 0x198   : > { %v1142_v54 = vmax.f32 %v2273_v53, %v2271_v52  ;;  %v2277_v57 = vadd.f32 %v1120_v55, %v1049_v43  ;;  %v2343_v55 = vand.u32 127, %v1136_v49 }
 0x19a   : > { %1143 = vmax.xlane.f32.xlu0 %v1142_v54  ;;  %vm1249_vm10 = vcmp.eq.s32.totalorder %v2343_v55, %v2319_v23  ;;  %vm1253_vm11 = vcmp.eq.s32.totalorder %v2343_v55, %v1240_v41  ;;  %vm1251_vm14 = vcmp.eq.s32.totalorder %v2343_v55, %v2327_v30 }
 0x19b   : > { %v1127_v14 = vpop.f32.mrf.mxu2 }
 0x19c   : > { %v2299_v9 = vadd.f32 %v1127_v14, %v1049_v43 }
 0x19d   : > { %v1096_v56 = vpop.f32.mrf.mxu3 }
 0x19e   : > { %v2279_v59 = vadd.f32 %v1096_v56, %v1048_v44 }
 0x19f   : > { %v1122_v60 = vpop.f32.mrf.mxu0 }
 0x1a0   : > { %v1145_v58 = vmax.f32 %v2279_v59, %v2277_v57  ;;  %v2283_v2 = vadd.f32 %v1122_v60, %v1049_v43 }
 0x1a2   : > { %1146 = vmax.xlane.f32.xlu1 %v1145_v58 }
 0x1a5   : > { %v1098_v63 = vpop.f32.mrf.mxu3 }
 0x1a6   : > { %v2285_v3 = vadd.f32 %v1098_v63, %v1048_v44 }
 0x1a8   : > { %v1148_v0 = vmax.f32 %v2285_v3, %v2283_v2 }
 0x1aa   : > { %1149 = vmax.xlane.f32.xlu1 %v1148_v0 }
 0x1ad   : > { %v1101_v6 = vpop.f32.mrf.mxu3 }
 0x1ae   : > { %v2294_v13 = vadd.f32 %v1101_v6, %v1048_v44  ;;  %1230 = vperm.xlu0 %1858, %v2290_v5  }
 0x1b0   : > { %v1151_v11 = vmax.f32 %v2294_v13, %v2292_v7 }
 0x1b2   : > { %1152 = vmax.xlane.f32.xlu2 %v1151_v11  ;;  %v1138_v11 = vadd.s32 128, %v2343_v55 }
 0x1b4   : > { %vm1250_vm12 = vcmp.eq.s32.totalorder %v1138_v11, %v2319_v23  ;;  %vm1254_vm13 = vcmp.eq.s32.totalorder %v1138_v11, %v1240_v41  ;;  %vm1252_vm1 = vcmp.eq.s32.totalorder %v1138_v11, %v2327_v30 }
 0x1b5   : > { %v1103_v16 = vpop.f32.mrf.mxu3 }
 0x1b6   : > { %v2301_v62 = vadd.f32 %v1103_v16, %v1048_v44 }
 0x1b8   : > { %v1154_v10 = vmax.f32 %v2301_v62, %v2299_v9 }
 0x1ba   : > { %1155 = vmax.xlane.f32.xlu2 %v1154_v10 }
 0x1c3   : > { %1242 = vperm.xlu1 %1859, %v2306_v17  }
 0x1d2   : > { %1245 = vperm.xlu2 %1860, %v2310_v19  }
 0x205   : > { %v2313_v61 = vpop.xlane.xlu0 %1140 }
 0x206   : > { %v1157_v20 = vsub.f32 %v2267_v47, %v2313_v61  ;;  %v1158_v21 = vsub.f32 %v2265_v46, %v2313_v61 }
 0x208   : > { %v1169_v22 = vmul.f32 1.442695, %v1157_v20  ;;  %v1171_v15 = vmul.f32 1.442695, %v1158_v21 }
 0x20a   : > { %1862 = vpow2.f32 %v1169_v22 }
 0x20b   : > { %1864 = vpow2.f32 %v1171_v15 }
 0x20d   : > { %v2321_v24 = vpop.xlane.xlu0 %1143 }
 0x20e   : > { %v1159_v25 = vsub.f32 %v2273_v53, %v2321_v24  ;;  %v1160_v26 = vsub.f32 %v2271_v52, %v2321_v24 }
 0x210   : > { %v1863_v1 = vpop.eup %1862  ;;  %v1173_v27 = vmul.f32 1.442695, %v1159_v25  ;;  %v1175_v28 = vmul.f32 1.442695, %v1160_v26 }
 0x211   : > { %v1865_v29 = vpop.eup %1864 }
 0x212   : > { %1866 = vpow2.f32 %v1173_v27  ;;  %v1193_v18 = vadd.f32 %v1865_v29, %v1863_v1  ;;  %v1265_v29 = vsel %vm1253_vm11, %v2285_v3, 0.0 }
 0x213   : > { %1868 = vpow2.f32 %v1175_v28 }
 0x214   : > { %1194 = vadd.xlane.f32.xlu1 %v1193_v18 }
 0x215   : > { %v2329_v32 = vpop.xlane.xlu1 %1146 }
 0x216   : > { %v1161_v33 = vsub.f32 %v2279_v59, %v2329_v32  ;;  %v1162_v34 = vsub.f32 %v2277_v57, %v2329_v32 }
 0x218   : > { %v1867_v37 = vpop.eup %1866  ;;  %v1177_v12 = vmul.f32 1.442695, %v1161_v33  ;;  %v1179_v38 = vmul.f32 1.442695, %v1162_v34  ;;  %v1262_v34 = vsel %vm1250_vm12, %v2271_v52, 0.0 }
 0x219   : > { %v1869_v39 = vpop.eup %1868 }
 0x21a   : > { %1870 = vpow2.f32 %v1177_v12  ;;  %v1196_v40 = vadd.f32 %v1869_v39, %v1867_v37 }
 0x21b   : > { %1872 = vpow2.f32 %v1179_v38  ;;  %v1266_v38 = vsel %vm1254_vm13, %v2283_v2, 0.0 }
 0x21c   : > { %1197 = vadd.xlane.f32.xlu0 %v1196_v40  ;;  %v1280_v39 = vadd.f32 %v1266_v38, %v1265_v29 }
 0x21d   : > { %v2335_v31 = vpop.xlane.xlu1 %1149 }
 0x21e   : > { %v1163_v36 = vsub.f32 %v2285_v3, %v2335_v31  ;;  %v1164_v42 = vsub.f32 %v2283_v2, %v2335_v31  ;;  %v1263_v3 = vsel %vm1251_vm14, %v2279_v59, 0.0  ;;  %v1264_v2 = vsel %vm1252_vm1, %v2277_v57, 0.0 }
 0x21f   : > { %v1277_v41 = vadd.f32 %v1264_v2, %v1263_v3 }
 0x220   : > { %v1871_v43 = vpop.eup %1870  ;;  %v1181_v44 = vmul.f32 1.442695, %v1163_v36  ;;  %v1183_v45 = vmul.f32 1.442695, %v1164_v42  ;;  %v1231_v6 = vpop.permute.xlu0 %1230 }
 0x221   : > { %v1873_v48 = vpop.eup %1872  ;;  %vm1247_vm8 = vcmp.eq.s32.totalorder %v2343_v55, %v1231_v6  ;;  %vm1248_vm9 = vcmp.eq.s32.totalorder %v1138_v11, %v1231_v6 }
 0x222   : > { %1874 = vpow2.f32 %v1181_v44  ;;  %v1199_v51 = vadd.f32 %v1873_v48, %v1871_v43  ;;  %v1259_v21 = vsel %vm1247_vm8, %v2267_v47, 0.0  ;;  %v1260_v22 = vsel %vm1248_vm9, %v2265_v46, 0.0 }
 0x223   : > { %1876 = vpow2.f32 %v1183_v45  ;;  %v1271_v28 = vadd.f32 %v1260_v22, %v1259_v21  ;;  %v1261_v46 = vsel %vm1249_vm10, %v2273_v53, 0.0  ;;  %vm1292_vm8 = vcmp.ge.s32.totalorder %v2254_v35, 0 }
 0x224   : > { %1200 = vadd.xlane.f32.xlu2 %v1199_v51  ;;  %v1274_v37 = vadd.f32 %v1262_v34, %v1261_v46  ;;  %vm1293_vm9 = vcmp.ge.s32.totalorder %v2306_v17, 0  ;;  %vm1294_vm10 = vcmp.ge.s32.totalorder %v2310_v19, 0 }
 0x225   : > { %v2341_v54 = vpop.xlane.xlu2 %1152 }
 0x226   : > { %v1165_v56 = vsub.f32 %v2294_v13, %v2341_v54  ;;  %v1166_v58 = vsub.f32 %v2292_v7, %v2341_v54 }
 0x228   : > { %v1875_v60 = vpop.eup %1874  ;;  %v1185_v63 = vmul.f32 1.442695, %v1165_v56  ;;  %v1187_v0 = vmul.f32 1.442695, %v1166_v58  ;;  %v1907_v56 = vmov 0.0  }
 0x229   : > { %v1877_v4 = vpop.eup %1876  ;;  %v1740_v58 = vsel %vm1289_vm4, 1.0, %v1907_v56  ;;  %v1742_v46 = vsel %vm1291_vm7, 1.0, %v1907_v56  ;;  %v1743_v8 = vsel %vm1292_vm8, 1.0, %v1907_v56 }
 0x22a   : > { %1878 = vpow2.f32 %v1185_v63  ;;  %v1202_v14 = vadd.f32 %v1877_v4, %v1875_v60  ;;  %v1741_v4 = vsel %vm1290_vm5, 1.0, %v1907_v56 }
 0x22b   : > { %1880 = vpow2.f32 %v1187_v0 }
 0x22c   : > { %1203 = vadd.xlane.f32.xlu1 %v1202_v14 }
 0x22d   : > { %v2351_v16 = vpop.xlane.xlu2 %1155 }
 0x22e   : > { %v1167_v10 = vsub.f32 %v2301_v62, %v2351_v16  ;;  %v1168_v20 = vsub.f32 %v2299_v9, %v2351_v16 }
 0x230   : > { %v1879_v15 = vpop.eup %1878  ;;  %v1189_v25 = vmul.f32 1.442695, %v1167_v10  ;;  %v1191_v26 = vmul.f32 1.442695, %v1168_v20 }
 0x231   : > { %v1881_v1 = vpop.eup %1880 }
 0x232   : > { %1882 = vpow2.f32 %v1189_v25  ;;  %v1205_v27 = vadd.f32 %v1881_v1, %v1879_v15 }
 0x233   : > { %1884 = vpow2.f32 %v1191_v26 }
 0x234   : > { %1206 = vadd.xlane.f32.xlu2 %v1205_v27  ;;  %1272 = vadd.xlane.f32.xlu1 %v1271_v28 }
 0x235   : > { %v1243_v33 = vpop.permute.xlu1 %1242  ;;  %v1246_v23 = vpop.permute.xlu2 %1245 }
 0x236   : > { %vm1255_vm15 = vcmp.eq.s32.totalorder %v2343_v55, %v1243_v33  ;;  %vm1256_vm0 = vcmp.eq.s32.totalorder %v1138_v11, %v1243_v33  ;;  %vm1257_vm2 = vcmp.eq.s32.totalorder %v2343_v55, %v1246_v23  ;;  %vm1258_vm3 = vcmp.eq.s32.totalorder %v1138_v11, %v1246_v23 }
 0x237   : > { %v1267_v53 = vsel %vm1255_vm15, %v2294_v13, 0.0  ;;  %v1268_v52 = vsel %vm1256_vm0, %v2292_v7, 0.0  ;;  %v1269_v36 = vsel %vm1257_vm2, %v2301_v62, 0.0  ;;  %v1270_v30 = vsel %vm1258_vm3, %v2299_v9, 0.0 }
 0x238   : > { %v1883_v47 = vpop.eup %1882  ;;  %v1283_v40 = vadd.f32 %v1268_v52, %v1267_v53  ;;  %v1286_v42 = vadd.f32 %v1270_v30, %v1269_v36  ;;  %v1744_v33 = vsel %vm1293_vm9, 1.0, %v1907_v56 }
 0x239   : > { %v1885_v18 = vpop.eup %1884 }
 0x23a   : > { %v1208_v12 = vadd.f32 %v1885_v18, %v1883_v47 }
 0x23c   : > { %1275 = vadd.xlane.f32.xlu2 %v1274_v37  ;;  %1209 = vadd.xlane.f32.xlu0 %v1208_v12 }
 0x23d   : > { %1281 = vadd.xlane.f32.xlu1 %v1280_v39  ;;  %v1745_v39 = vsel %vm1294_vm10, 1.0, %v1907_v56 }
 0x244   : > { %1284 = vadd.xlane.f32.xlu2 %v1283_v40  ;;  %1278 = vadd.xlane.f32.xlu0 %v1277_v41 }
 0x24c   : > { %1287 = vadd.xlane.f32.xlu0 %v1286_v42 }
 0x287   : > { %v1195_v13 = vpop.xlane.xlu1 %1194 }
 0x288   : > { %1886 = vlog2.f32 %v1195_v13 }
 0x28e   : > { %v1887_v57 = vpop.eup %1886 }
 0x28f   : > { %v1198_v7 = vpop.xlane.xlu0 %1197  ;;  %v1212_v44 = vmul.f32 0.6931472, %v1887_v57 }
 0x290   : > { %1888 = vlog2.f32 %v1198_v7 }
 0x291   : > { %v1223_v9 = vadd.f32 %v1212_v44, %v2313_v61 }
 0x296   : > { %v1889_v45 = vpop.eup %1888 }
 0x297   : > { %v1201_v59 = vpop.xlane.xlu2 %1200  ;;  %v1214_v62 = vmul.f32 0.6931472, %v1889_v45 }
 0x299   : > { %v1224_v63 = vadd.f32 %v1214_v62, %v2321_v24 }
 0x29f   : > { %v1204_v43 = vpop.xlane.xlu1 %1203 }
 0x2a0   : > { %1890 = vlog2.f32 %v1204_v43 }
 0x2a1   : > { %1892 = vlog2.f32 %v1201_v59 }
 0x2a6   : > { %v1891_v55 = vpop.eup %1890 }
 0x2a7   : > { %v1207_v48 = vpop.xlane.xlu2 %1206  ;;  %v1273_v49 = vpop.xlane.xlu1 %1272  ;;  %v1218_v14 = vmul.f32 0.6931472, %v1891_v55 }
 0x2a8   : > { %1894 = vlog2.f32 %v1207_v48  ;;  %v1307_v51 = vsub.f32 %v1223_v9, %v1273_v49  ;;  %v1893_v60 = vpop.eup %1892 }
 0x2a9   : > { %v1216_v5 = vmul.f32 0.6931472, %v1893_v60  ;;  %v1226_v15 = vadd.f32 %v1218_v14, %v2335_v31 }
 0x2aa   : > { %v1313_v10 = vmul.f32 %v1740_v58, %v1307_v51 }
 0x2ab   : > { %v1225_v27 = vadd.f32 %v1216_v5, %v2329_v32 }
 0x2ac   : > { %v1320_v22 = vsel %vm1319_vm6, %v1313_v10, 0.0 }
 0x2ae   : > { %v1895_v0 = vpop.eup %1894 }
 0x2af   : > { %v1276_v6 = vpop.xlane.xlu2 %1275  ;;  %v1210_v11 = vpop.xlane.xlu0 %1209  ;;  %v1220_v61 = vmul.f32 0.6931472, %v1895_v0 }
 0x2b0   : > { %v1308_v20 = vsub.f32 %v1224_v63, %v1276_v6  ;;  %1896 = vlog2.f32 %v1210_v11  ;;  %v1282_v50 = vpop.xlane.xlu1 %1281 }
 0x2b1   : > { %v1310_v26 = vsub.f32 %v1226_v15, %v1282_v50  ;;  %v1227_v1 = vadd.f32 %v1220_v61, %v2341_v54 }
 0x2b2   : > { %v1314_v21 = vmul.f32 %v1741_v4, %v1308_v20 }
 0x2b3   : > { %v1316_v34 = vmul.f32 %v1743_v8, %v1310_v26 }
 0x2b4   : > { %v1321_v24 = vsel %vm1319_vm6, %v1314_v21, 0.0 }
 0x2b5   : > { %v1322_v25 = vadd.f32 %v1321_v24, %v1320_v22  ;;  %v1325_v54 = vsel %vm1319_vm6, %v1316_v34, 0.0 }
 0x2b6   : > { %v1897_v28 = vpop.eup %1896 }
 0x2b7   : > { %v1285_v47 = vpop.xlane.xlu2 %1284  ;;  %v1279_v29 = vpop.xlane.xlu0 %1278  ;;  %v1222_v37 = vmul.f32 0.6931472, %v1897_v28 }
 0x2b8   : > { %v1311_v35 = vsub.f32 %v1227_v1, %v1285_v47  ;;  %v1309_v18 = vsub.f32 %v1225_v27, %v1279_v29 }
 0x2b9   : > { %v1228_v32 = vadd.f32 %v1222_v37, %v2351_v16 }
 0x2ba   : > { %v1315_v12 = vmul.f32 %v1742_v46, %v1309_v18  ;;  %v1317_v31 = vmul.f32 %v1744_v33, %v1311_v35 }
 0x2bc   : > { %v1323_v17 = vsel %vm1319_vm6, %v1315_v12, 0.0  ;;  %v1327_v23 = vsel %vm1319_vm6, %v1317_v31, 0.0 }
 0x2bd   : > { %v1324_v38 = vadd.f32 %v1323_v17, %v1322_v25 }
 0x2bf   : > { %v1288_v53 = vpop.xlane.xlu0 %1287  ;;  %v1326_v52 = vadd.f32 %v1325_v54, %v1324_v38 }
 0x2c0   : > { %v1312_v3 = vsub.f32 %v1228_v32, %v1288_v53 }
 0x2c1   : > { %v1328_v2 = vadd.f32 %v1327_v23, %v1326_v52 }
 0x2c2   : > { %v1318_v40 = vmul.f32 %v1745_v39, %v1312_v3 }
 0x2c4   : > { %v1329_v19 = vsel %vm1319_vm6, %v1318_v40, 0.0 }
 0x2c5   : > { %v1330_v41 = vadd.f32 %v1329_v19, %v1328_v2 }
 0x2c7   : > { %1331 = vadd.xlane.f32.xlu1 %v1330_v41 }
 0x33a   : > { %v1332_v36 = vpop.xlane.xlu1 %1331 }
 0x33b   : > { %v1333_v30 = vrot.slane %v1332_v36, 4 }
 0x33d   : > { %v1334_v42 = vadd.f32 %v1333_v30, %v1332_v36 }
 0x33f   : > { %v1335_v13 = vrot.slane %v1334_v42, 2 }
 0x341   : > { %v1336_v7 = vadd.f32 %v1335_v13, %v1334_v42 }
 0x343   : > { %v1337_v16 = vrot.slane %v1336_v7, 1 }
 0x345   : > { %v1338_v59 = vadd.f32 %v1337_v16, %v1336_v7 }
 0x347   : > { %1846 = vpush %v1338_v59 }
 0x378   : > { %s1847_s14 = spop %1846 }
 0x379   : > { %v1340_v43 = vstv %s1847_s14 }
 0x37a   : > { %1341 = vst [vmem:[%s276_s13] sm:$0xff] %v1340_v43 }
 0x37b PF: > { %s16_s21 = sadd.s32 1, %s1904_s21  }
 0x37c   : > { %p13_p5 = scmp.ge.s32.totalorder %s16_s21, 4  }
 0x37e   :  { %15 = sbr.rel (!%p13_p5) target bundleno = 1 (0x1), region = 77 }

</bundles_post_ra>
